<compile_context>
chip_gen: v6e
topology: v6e:2x2x1
jax: 0.10.0
libtpu: 0.0.40
codegen_flags: <defaults>
</compile_context>

<pallas_src>
import functools
import math

import jax
import jax.numpy as jnp
import numpy as np
from jax.experimental import pallas as pl
from jax.experimental.pallas import tpu as pltpu


# ----------------------------------------------------------------------------
# Helpers
# ----------------------------------------------------------------------------
def _layernorm(x, gamma, beta, eps=1e-5):
    mu = jnp.mean(x, axis=-1, keepdims=True)
    var = jnp.mean((x - mu) ** 2, axis=-1, keepdims=True)
    return (x - mu) * jax.lax.rsqrt(var + eps) * gamma + beta


def _pick_vmem_limit():
    """~3/4 of physical VMEM, capped at 100 MiB; safe fallback if unknown."""
    try:
        info = pltpu.get_tpu_info()
        cap = int(getattr(info, "vmem_capacity_bytes", 128 * 1024 * 1024))
        return min((cap * 3) // 4, 100 * 1024 * 1024)
    except Exception:
        return 48 * 1024 * 1024


# ----------------------------------------------------------------------------
# Pallas kernel
# ----------------------------------------------------------------------------
def gpt_decoder_kernel(mask_ref, x_ref,
                       wqkv_ref, bqkv_ref, wo_ref, bo_ref,
                       w1_ref, b1_ref, w2_ref, b2_ref,
                       ln_ref, fn_ref,
                       o_ref, act_ref,
                       *, num_heads, head_dim, batch_block, apply_final_norm):
    """One grid step = (batch block bb, layer l).

    act_ref (VMEM scratch) keeps the activation of the Bt batch elements
    resident across the whole layer axis; HBM is read once (layer 0) and
    written once (last layer, with the final LayerNorm folded in).
    """
    l = pl.program_id(1)
    n_layers = pl.num_programs(1)
    H, Dh, Bt = num_heads, head_dim, batch_block
    bf16 = jnp.bfloat16

    @pl.when(l == 0)
    def _():
        act_ref[...] = x_ref[...]

    x = act_ref[...]                              # (Bt, S, D) f32
    _, S, D = x.shape
    mask = mask_ref[...]                          # (S, S) additive mask
    ln = ln_ref[0]                                # (4, D): g1, b1, g2, b2

    x2d = x.reshape(Bt * S, D)

    # ---- fused, lane-dense QKV projection: one (Bt*S, D) @ (D, 3D) matmul ---
    qkv = jnp.dot(x2d.astype(bf16), wqkv_ref[0],
                  preferred_element_type=jnp.float32) + bqkv_ref[0]   # (Bt*S, 3D)

    scale = 1.0 / math.sqrt(Dh)

    def split_heads(t2d):   # (S, D) -> (H, S, Dh); layout shuffle only (no MXU)
        return jnp.concatenate(
            [t2d[None, :, h * Dh:(h + 1) * Dh] for h in range(H)], axis=0)

    def merge_heads(t3d):   # (H, S, Dh) -> (S, D)
        return jnp.concatenate([t3d[h] for h in range(H)], axis=1)

    # ---- causal multi-head self-attention (per batch element, static unroll;
    #      the head axis is the single leading batch dim of 3-D einsums) ------
    ctx_rows = []
    for b in range(Bt):
        qkv_b = qkv[b * S:(b + 1) * S]                       # (S, 3D)
        qh = split_heads(qkv_b[:, 0 * D:1 * D]) * scale      # (H, S, Dh)
        kh = split_heads(qkv_b[:, 1 * D:2 * D])
        vh = split_heads(qkv_b[:, 2 * D:3 * D])

        s = jnp.einsum('hqe,hke->hqk', qh.astype(bf16), kh.astype(bf16),
                       preferred_element_type=jnp.float32) + mask     # (H,S,S)
        s = s - jnp.max(s, axis=-1, keepdims=True)
        p = jnp.exp(s)
        p = p / jnp.sum(p, axis=-1, keepdims=True)           # exact softmax
        ctx = jnp.einsum('hqk,hke->hqe', p.astype(bf16), vh.astype(bf16),
                         preferred_element_type=jnp.float32)  # (H, S, Dh)
        ctx_rows.append(merge_heads(ctx))                     # (S, D)

    ctx2d = ctx_rows[0] if Bt == 1 else jnp.concatenate(ctx_rows, axis=0)

    # output projection: single matmul, head reduction done inside the MXU
    attn = jnp.dot(ctx2d.astype(bf16), wo_ref[0],
                   preferred_element_type=jnp.float32) + bo_ref[0]    # (Bt*S, D)

    # ---- residual + LN1, FFN (ReLU), residual + LN2 --------------------------
    x2 = _layernorm(x2d + attn, ln[0:1], ln[1:2])

    ff = jnp.dot(x2.astype(bf16), w1_ref[0],
                 preferred_element_type=jnp.float32) + b1_ref[0]
    ff = jnp.maximum(ff, 0.0)
    ff = jnp.dot(ff.astype(bf16), w2_ref[0],
                 preferred_element_type=jnp.float32) + b2_ref[0]
    y = _layernorm(x2 + ff, ln[2:3], ln[3:4])

    act_ref[...] = y.reshape(Bt, S, D)

    @pl.when(l == n_layers - 1)
    def _():
        if apply_final_norm:
            fn = fn_ref[...]                                   # (2, D)
            o_ref[...] = _layernorm(y, fn[0:1], fn[1:2]).reshape(Bt, S, D)
        else:
            o_ref[...] = y.reshape(Bt, S, D)


# ----------------------------------------------------------------------------
# Weight packing (layer-stacked, bf16 matmul weights, f32 biases/norm params)
# ----------------------------------------------------------------------------
def _pack_params(layer_params, final_norm_params):
    wdt = jnp.bfloat16
    f32 = jnp.float32
    D = layer_params[0]["wqkv"].shape[0]
    packed = dict(
        wqkv=jnp.stack([p["wqkv"] for p in layer_params]).astype(wdt),  # (L,D,3D)
        bqkv=jnp.stack([p["bqkv"] for p in layer_params]).astype(f32),  # (L,1,3D)
        wo=jnp.stack([p["wo"] for p in layer_params]).astype(wdt),      # (L,D,D)
        bo=jnp.stack([p["bo"] for p in layer_params]).astype(f32),      # (L,1,D)
        w1=jnp.stack([p["w1"] for p in layer_params]).astype(wdt),      # (L,D,FF)
        b1=jnp.stack([p["b1"] for p in layer_params]).astype(f32),      # (L,1,FF)
        w2=jnp.stack([p["w2"] for p in layer_params]).astype(wdt),      # (L,FF,D)
        b2=jnp.stack([p["b2"] for p in layer_params]).astype(f32),      # (L,1,D)
        ln=jnp.stack([jnp.concatenate([p["g1"], p["be1"], p["g2"], p["be2"]],
                                      axis=0)
                      for p in layer_params]).astype(f32),              # (L,4,D)
    )
    if final_norm_params is not None:
        packed["fn"] = jnp.concatenate([final_norm_params["gamma"],
                                        final_norm_params["beta"]],
                                       axis=0).astype(f32)              # (2,D)
    else:
        packed["fn"] = jnp.stack([jnp.ones((D,), f32), jnp.zeros((D,), f32)])
    return packed


# ----------------------------------------------------------------------------
# Wrapper
# ----------------------------------------------------------------------------
def gpt_decoder_forward(tgt, tgt_mask, layer_params, final_norm_params,
                        batch_block=None):
    """Pallas implementation of GPTDecoder.forward (single fused kernel)."""
    B, S, D = tgt.shape
    L = len(layer_params)
    H = layer_params[0]["num_heads"]
    Dh = D // H
    FF = layer_params[0]["w1"].shape[1]

    if batch_block is None:
        batch_block = min(B, 4)      # amortize per-layer weight DMA over Bt
    Bt = batch_block
    assert B % Bt == 0, "batch must be divisible by batch_block"
    num_bb = B // Bt

    packed = _pack_params(layer_params, final_norm_params)
    apply_final_norm = final_norm_params is not None

    kernel = functools.partial(gpt_decoder_kernel, num_heads=H, head_dim=Dh,
                               batch_block=Bt,
                               apply_final_norm=apply_final_norm)

    # Advisory cost estimate for XLA's scheduler (weights re-read per batch block).
    flops = (2 * B * L * S * D * (3 * D + D + 2 * FF)
             + 4 * B * L * H * S * S * Dh)
    transcendentals = B * L * (H * S * S + 4 * S)
    weight_bytes = sum(int(v.size) * v.dtype.itemsize
                       for k, v in packed.items() if k != "fn")
    bytes_accessed = (2 * int(tgt.size) * 4 + int(tgt_mask.size) * 4
                      + num_bb * weight_bytes + int(packed["fn"].size) * 4)

    return pl.pallas_call(
        kernel,
        out_shape=jax.ShapeDtypeStruct((B, S, D), jnp.float32),
        grid_spec=pltpu.PrefetchScalarGridSpec(
            num_scalar_prefetch=0,
            grid=(num_bb, L),
            in_specs=[
                pl.BlockSpec((S, S), lambda bb, l: (0, 0)),               # mask
                pl.BlockSpec((Bt, S, D), lambda bb, l: (bb, 0, 0)),       # x
                pl.BlockSpec((1, D, 3 * D), lambda bb, l: (l, 0, 0)),     # wqkv
                pl.BlockSpec((1, 1, 3 * D), lambda bb, l: (l, 0, 0)),     # bqkv
                pl.BlockSpec((1, D, D), lambda bb, l: (l, 0, 0)),         # wo
                pl.BlockSpec((1, 1, D), lambda bb, l: (l, 0, 0)),         # bo
                pl.BlockSpec((1, D, FF), lambda bb, l: (l, 0, 0)),        # w1
                pl.BlockSpec((1, 1, FF), lambda bb, l: (l, 0, 0)),        # b1
                pl.BlockSpec((1, FF, D), lambda bb, l: (l, 0, 0)),        # w2
                pl.BlockSpec((1, 1, D), lambda bb, l: (l, 0, 0)),         # b2
                pl.BlockSpec((1, 4, D), lambda bb, l: (l, 0, 0)),         # ln1/ln2
                pl.BlockSpec((2, D), lambda bb, l: (0, 0)),               # final norm
            ],
            out_specs=pl.BlockSpec((Bt, S, D), lambda bb, l: (bb, 0, 0)),
            scratch_shapes=[pltpu.VMEM((Bt, S, D), jnp.float32)],
        ),
        compiler_params=pltpu.CompilerParams(
            dimension_semantics=("parallel", "arbitrary"),
            vmem_limit_bytes=_pick_vmem_limit()),
        cost_estimate=pl.CostEstimate(flops=flops,
                                      transcendentals=transcendentals,
                                      bytes_accessed=bytes_accessed),
    )(tgt_mask, tgt,
      packed["wqkv"], packed["bqkv"], packed["wo"], packed["bo"],
      packed["w1"], packed["b1"], packed["w2"], packed["b2"],
      packed["ln"], packed["fn"])


# ----------------------------------------------------------------------------
# Pure-JAX reference (f32, original param layout) for verification
# ----------------------------------------------------------------------------
def ref_layer(x, mask, p, num_heads):
    B, S, D = x.shape
    Dh = D // num_heads
    qkv = x @ p["wqkv"] + p["bqkv"]
    q, k, v = qkv[..., :D], qkv[..., D:2 * D], qkv[..., 2 * D:]

    def split(t):
        return t.reshape(B, S, num_heads, Dh).transpose(0, 2, 1, 3)

    q, k, v = split(q), split(k), split(v)
    s = jnp.einsum("bhqd,bhkd->bhqk", q, k) / math.sqrt(Dh) + mask
    p_attn = jax.nn.softmax(s, axis=-1)
    a = jnp.einsum("bhqk,bhkd->bhqd", p_attn, v)
    a = a.transpose(0, 2, 1, 3).reshape(B, S, D)
    a = a @ p["wo"] + p["bo"]
    x2 = _layernorm(x + a, p["g1"], p["be1"])
    ff = jnp.maximum(x2 @ p["w1"] + p["b1"], 0.0) @ p["w2"] + p["b2"]
    return _layernorm(x2 + ff, p["g2"], p["be2"])


def ref_forward(tgt, mask, layer_params, final_norm_params):
    out = tgt
    for p in layer_params:
        out = ref_layer(out, mask, p, p["num_heads"])
    if final_norm_params is not None:
        out = _layernorm(out, final_norm_params["gamma"],
                         final_norm_params["beta"])
    return out


# ----------------------------------------------------------------------------
# Main
# ----------------------------------------------------------------------------
if __name__ == "__main__":
    # Lane-dense small shapes: D multiple of 128, S multiple of 8.
    B, S, D, H, FF, L = 2, 16, 128, 4, 256, 2

    key = jax.random.PRNGKey(0)

    def make_layer(k):
        ks = jax.random.split(k, 6)
        scale = 0.05
        return {
            "num_heads": H,
            "wqkv": scale * jax.random.normal(ks[0], (D, 3 * D), jnp.float32),
            "bqkv": scale * jax.random.normal(ks[1], (1, 3 * D), jnp.float32),
            "wo":   scale * jax.random.normal(ks[2], (D, D), jnp.float32),
            "bo":   scale * jax.random.normal(ks[3], (1, D), jnp.float32),
            "w1":   scale * jax.random.normal(ks[4], (D, FF), jnp.float32),
            "b1":   jnp.zeros((1, FF), jnp.float32),
            "w2":   scale * jax.random.normal(ks[5], (FF, D), jnp.float32),
            "b2":   jnp.zeros((1, D), jnp.float32),
            "g1":   jnp.ones((1, D), jnp.float32),
            "be1":  jnp.zeros((1, D), jnp.float32),
            "g2":   jnp.ones((1, D), jnp.float32),
            "be2":  jnp.zeros((1, D), jnp.float32),
        }

    key, *layer_keys = jax.random.split(key, L + 1)
    layer_params = [make_layer(k) for k in layer_keys]
    final_norm_params = {"gamma": jnp.ones((1, D), jnp.float32),
                         "beta": jnp.zeros((1, D), jnp.float32)}

    key, xkey = jax.random.split(key)
    tgt = jax.random.normal(xkey, (B, S, D), jnp.float32)

    # Additive causal tgt_mask: 0 where allowed, -1e9 above the diagonal.
    row = jax.lax.broadcasted_iota(jnp.int32, (S, S), 0)
    col = jax.lax.broadcasted_iota(jnp.int32, (S, S), 1)
    tgt_mask = jnp.where(col <= row, 0.0, -1e9).astype(jnp.float32)

    out = gpt_decoder_forward(tgt, tgt_mask, layer_params, final_norm_params)
    out = jax.block_until_ready(out)

    ref = ref_forward(tgt, tgt_mask, layer_params, final_norm_params)
    # Tolerance relaxed vs pure f32 because matmul operands are fed to the MXU
    # in bfloat16 (f32 accumulation); the reference is pure f32.
    np.testing.assert_allclose(np.asarray(out), np.asarray(ref),
                               rtol=3e-2, atol=3e-2)

    print("KERNEL_OK")
</pallas_src>

<mosaic_0001>
module attributes {stable_mosaic.version = 11 : i64} {
  func.func @gpt_decoder_kernel(%arg0: i32, %arg1: i32, %arg2: memref<16x16xf32, #tpu.memory_space<vmem>>, %arg3: memref<2x16x128xf32, #tpu.memory_space<vmem>>, %arg4: memref<1x128x384xbf16, #tpu.memory_space<vmem>>, %arg5: memref<1x1x384xf32, #tpu.memory_space<vmem>>, %arg6: memref<1x128x128xbf16, #tpu.memory_space<vmem>>, %arg7: memref<1x1x128xf32, #tpu.memory_space<vmem>>, %arg8: memref<1x128x256xbf16, #tpu.memory_space<vmem>>, %arg9: memref<1x1x256xf32, #tpu.memory_space<vmem>>, %arg10: memref<1x256x128xbf16, #tpu.memory_space<vmem>>, %arg11: memref<1x1x128xf32, #tpu.memory_space<vmem>>, %arg12: memref<1x4x128xf32, #tpu.memory_space<vmem>>, %arg13: memref<2x128xf32, #tpu.memory_space<vmem>>, %arg14: memref<2x16x128xf32, #tpu.memory_space<vmem>>, %arg15: memref<2x16x128xf32, #tpu.memory_space<vmem>>) attributes {dimension_semantics = [#tpu.dimension_semantics<parallel>, #tpu.dimension_semantics<arbitrary>], iteration_bounds = array<i64: 1, 2>, scalar_prefetch = 0 : i64, scratch_operands = 1 : i64, tpu.core_type = #tpu.core_type<tc>, window_params = [{pipeline_mode = #tpu.pipeline_mode<synchronous>, transform_indices = @transform_0, window_bounds = array<i64: 16, 16>}, {transform_indices = @transform_1, window_bounds = array<i64: 2, 16, 128>}, {transform_indices = @transform_2, window_bounds = array<i64: 1, 128, 384>}, {transform_indices = @transform_3, window_bounds = array<i64: 1, 1, 384>}, {transform_indices = @transform_4, window_bounds = array<i64: 1, 128, 128>}, {transform_indices = @transform_5, window_bounds = array<i64: 1, 1, 128>}, {transform_indices = @transform_6, window_bounds = array<i64: 1, 128, 256>}, {transform_indices = @transform_7, window_bounds = array<i64: 1, 1, 256>}, {transform_indices = @transform_8, window_bounds = array<i64: 1, 256, 128>}, {transform_indices = @transform_9, window_bounds = array<i64: 1, 1, 128>}, {transform_indices = @transform_10, window_bounds = array<i64: 1, 4, 128>}, {pipeline_mode = #tpu.pipeline_mode<synchronous>, transform_indices = @transform_11, window_bounds = array<i64: 2, 128>}, {transform_indices = @transform_12, window_bounds = array<i64: 2, 16, 128>}]} {
    %c0_i32 = arith.constant 0 : i32
    %0 = arith.cmpi eq, %arg1, %c0_i32 : i32
    %1 = arith.extui %0 : i1 to i32
    %c0_i32_0 = arith.constant 0 : i32
    %2 = arith.cmpi ne, %1, %c0_i32_0 : i32
    scf.if %2 {
      %c0_60 = arith.constant 0 : index
      %c0_61 = arith.constant 0 : index
      %c0_62 = arith.constant 0 : index
      %218 = vector.load %arg3[%c0_60, %c0_61, %c0_62] : memref<2x16x128xf32, #tpu.memory_space<vmem>>, vector<2x16x128xf32>
      %c0_63 = arith.constant 0 : index
      %c0_64 = arith.constant 0 : index
      %c0_65 = arith.constant 0 : index
      %219 = vector.load %arg15[%c0_63, %c0_64, %c0_65] : memref<2x16x128xf32, #tpu.memory_space<vmem>>, vector<2x16x128xf32>
      tpu.vector_store %arg15[%c0_63, %c0_64, %c0_65], %218 {strides = array<i32>} : memref<2x16x128xf32, #tpu.memory_space<vmem>>, vector<2x16x128xf32>,
    } else {
    }
    %c0 = arith.constant 0 : index
    %c0_1 = arith.constant 0 : index
    %c0_2 = arith.constant 0 : index
    %3 = vector.load %arg15[%c0, %c0_1, %c0_2] : memref<2x16x128xf32, #tpu.memory_space<vmem>>, vector<2x16x128xf32>
    %c0_3 = arith.constant 0 : index
    %c0_4 = arith.constant 0 : index
    %4 = vector.load %arg2[%c0_3, %c0_4] : memref<16x16xf32, #tpu.memory_space<vmem>>, vector<16x16xf32>
    %c0_5 = arith.constant 0 : index
    %c0_6 = arith.constant 0 : index
    %c0_7 = arith.constant 0 : index
    %5 = vector.load %arg12[%c0_5, %c0_6, %c0_7] : memref<1x4x128xf32, #tpu.memory_space<vmem>>, vector<1x4x128xf32>
    %6 = vector.shape_cast %5 : vector<1x4x128xf32> to vector<4x128xf32>
    %7 = vector.shape_cast %3 : vector<2x16x128xf32> to vector<32x128xf32>
    %8 = arith.truncf %7 : vector<32x128xf32> to vector<32x128xbf16>
    %c0_8 = arith.constant 0 : index
    %c0_9 = arith.constant 0 : index
    %c0_10 = arith.constant 0 : index
    %9 = vector.load %arg4[%c0_8, %c0_9, %c0_10] : memref<1x128x384xbf16, #tpu.memory_space<vmem>>, vector<1x128x384xbf16>
    %10 = vector.shape_cast %9 : vector<1x128x384xbf16> to vector<128x384xbf16>
    %cst = arith.constant dense<0.000000e+00> : vector<32x384xf32>
    %11 = tpu.matmul %8, %10, %cst {dimension_numbers = #tpu.dot_dimension_numbers<[1], [0], [0], [1], [0, 0, 1, 1], [], []>} : vector<32x128xbf16>, vector<128x384xbf16>, vector<32x384xf32> -> vector<32x384xf32>
    %c0_11 = arith.constant 0 : index
    %c0_12 = arith.constant 0 : index
    %c0_13 = arith.constant 0 : index
    %12 = vector.load %arg5[%c0_11, %c0_12, %c0_13] : memref<1x1x384xf32, #tpu.memory_space<vmem>>, vector<1x1x384xf32>
    %13 = vector.shape_cast %12 : vector<1x1x384xf32> to vector<1x384xf32>
    %14 = vector.broadcast %13 : vector<1x384xf32> to vector<32x384xf32>
    %15 = arith.addf %11, %14 : vector<32x384xf32>
    %16 = vector.extract_strided_slice %15 {offsets = [0, 0], sizes = [16, 384], strides = [1, 1]} : vector<32x384xf32> to vector<16x384xf32>
    %17 = vector.extract_strided_slice %16 {offsets = [0, 0], sizes = [16, 128], strides = [1, 1]} : vector<16x384xf32> to vector<16x128xf32>
    %18 = vector.extract_strided_slice %17 {offsets = [0, 0], sizes = [16, 32], strides = [1, 1]} : vector<16x128xf32> to vector<16x32xf32>
    %19 = vector.shape_cast %18 : vector<16x32xf32> to vector<1x16x32xf32>
    %20 = vector.extract_strided_slice %17 {offsets = [0, 32], sizes = [16, 32], strides = [1, 1]} : vector<16x128xf32> to vector<16x32xf32>
    %21 = vector.shape_cast %20 : vector<16x32xf32> to vector<1x16x32xf32>
    %22 = vector.extract_strided_slice %17 {offsets = [0, 64], sizes = [16, 32], strides = [1, 1]} : vector<16x128xf32> to vector<16x32xf32>
    %23 = vector.shape_cast %22 : vector<16x32xf32> to vector<1x16x32xf32>
    %24 = vector.extract_strided_slice %17 {offsets = [0, 96], sizes = [16, 32], strides = [1, 1]} : vector<16x128xf32> to vector<16x32xf32>
    %25 = vector.shape_cast %24 : vector<16x32xf32> to vector<1x16x32xf32>
    %26 = tpu.concatenate %19, %21, %23, %25 in 0 : vector<1x16x32xf32>, vector<1x16x32xf32>, vector<1x16x32xf32>, vector<1x16x32xf32> -> vector<4x16x32xf32>
    %cst_14 = arith.constant 0.176776692 : f32
    %27 = vector.broadcast %cst_14 : f32 to vector<4x16x32xf32>
    %28 = arith.mulf %26, %27 : vector<4x16x32xf32>
    %29 = vector.extract_strided_slice %16 {offsets = [0, 128], sizes = [16, 128], strides = [1, 1]} : vector<16x384xf32> to vector<16x128xf32>
    %30 = vector.extract_strided_slice %29 {offsets = [0, 0], sizes = [16, 32], strides = [1, 1]} : vector<16x128xf32> to vector<16x32xf32>
    %31 = vector.shape_cast %30 : vector<16x32xf32> to vector<1x16x32xf32>
    %32 = vector.extract_strided_slice %29 {offsets = [0, 32], sizes = [16, 32], strides = [1, 1]} : vector<16x128xf32> to vector<16x32xf32>
    %33 = vector.shape_cast %32 : vector<16x32xf32> to vector<1x16x32xf32>
    %34 = vector.extract_strided_slice %29 {offsets = [0, 64], sizes = [16, 32], strides = [1, 1]} : vector<16x128xf32> to vector<16x32xf32>
    %35 = vector.shape_cast %34 : vector<16x32xf32> to vector<1x16x32xf32>
    %36 = vector.extract_strided_slice %29 {offsets = [0, 96], sizes = [16, 32], strides = [1, 1]} : vector<16x128xf32> to vector<16x32xf32>
    %37 = vector.shape_cast %36 : vector<16x32xf32> to vector<1x16x32xf32>
    %38 = tpu.concatenate %31, %33, %35, %37 in 0 : vector<1x16x32xf32>, vector<1x16x32xf32>, vector<1x16x32xf32>, vector<1x16x32xf32> -> vector<4x16x32xf32>
    %39 = vector.extract_strided_slice %16 {offsets = [0, 256], sizes = [16, 128], strides = [1, 1]} : vector<16x384xf32> to vector<16x128xf32>
    %40 = vector.extract_strided_slice %39 {offsets = [0, 0], sizes = [16, 32], strides = [1, 1]} : vector<16x128xf32> to vector<16x32xf32>
    %41 = vector.shape_cast %40 : vector<16x32xf32> to vector<1x16x32xf32>
    %42 = vector.extract_strided_slice %39 {offsets = [0, 32], sizes = [16, 32], strides = [1, 1]} : vector<16x128xf32> to vector<16x32xf32>
    %43 = vector.shape_cast %42 : vector<16x32xf32> to vector<1x16x32xf32>
    %44 = vector.extract_strided_slice %39 {offsets = [0, 64], sizes = [16, 32], strides = [1, 1]} : vector<16x128xf32> to vector<16x32xf32>
    %45 = vector.shape_cast %44 : vector<16x32xf32> to vector<1x16x32xf32>
    %46 = vector.extract_strided_slice %39 {offsets = [0, 96], sizes = [16, 32], strides = [1, 1]} : vector<16x128xf32> to vector<16x32xf32>
    %47 = vector.shape_cast %46 : vector<16x32xf32> to vector<1x16x32xf32>
    %48 = tpu.concatenate %41, %43, %45, %47 in 0 : vector<1x16x32xf32>, vector<1x16x32xf32>, vector<1x16x32xf32>, vector<1x16x32xf32> -> vector<4x16x32xf32>
    %49 = arith.truncf %28 : vector<4x16x32xf32> to vector<4x16x32xbf16>
    %50 = arith.truncf %38 : vector<4x16x32xf32> to vector<4x16x32xbf16>
    "tpu.trace_start"() <{level = 10 : i32, message = "hqe,hke->hqk"}> : () -> ()
    %cst_15 = arith.constant dense<0.000000e+00> : vector<4x16x16xf32>
    %51 = tpu.matmul %49, %50, %cst_15 {dimension_numbers = #tpu.dot_dimension_numbers<[2], [2], [1], [1], [0, 0, 0, 1, 1, 1], [0], [0]>} : vector<4x16x32xbf16>, vector<4x16x32xbf16>, vector<4x16x16xf32> -> vector<4x16x16xf32>
    "tpu.trace_stop"() : () -> ()
    %52 = vector.shape_cast %4 : vector<16x16xf32> to vector<1x16x16xf32>
    %53 = vector.broadcast %52 : vector<1x16x16xf32> to vector<4x16x16xf32>
    %54 = arith.addf %51, %53 : vector<4x16x16xf32>
    %cst_16 = arith.constant dense<0xFF800000> : vector<4x16xf32>
    %55 = vector.multi_reduction <maximumf>, %54, %cst_16 [2] : vector<4x16x16xf32> to vector<4x16xf32>
    %56 = vector.shape_cast %55 : vector<4x16xf32> to vector<4x16x1xf32>
    %57 = vector.broadcast %56 : vector<4x16x1xf32> to vector<4x16x16xf32>
    %58 = arith.subf %54, %57 : vector<4x16x16xf32>
    %59 = math.exp %58 : vector<4x16x16xf32>
    %cst_17 = arith.constant dense<0.000000e+00> : vector<4x16xf32>
    %60 = vector.multi_reduction <add>, %59, %cst_17 [2] : vector<4x16x16xf32> to vector<4x16xf32>
    %61 = vector.shape_cast %60 : vector<4x16xf32> to vector<4x16x1xf32>
    %62 = vector.broadcast %61 : vector<4x16x1xf32> to vector<4x16x16xf32>
    %63 = arith.divf %59, %62 : vector<4x16x16xf32>
    %64 = arith.truncf %63 : vector<4x16x16xf32> to vector<4x16x16xbf16>
    %65 = arith.truncf %48 : vector<4x16x32xf32> to vector<4x16x32xbf16>
    "tpu.trace_start"() <{level = 10 : i32, message = "hqk,hke->hqe"}> : () -> ()
    %cst_18 = arith.constant dense<0.000000e+00> : vector<4x16x32xf32>
    %66 = tpu.matmul %64, %65, %cst_18 {dimension_numbers = #tpu.dot_dimension_numbers<[2], [1], [1], [2], [0, 0, 0, 1, 1, 2], [0], [0]>} : vector<4x16x16xbf16>, vector<4x16x32xbf16>, vector<4x16x32xf32> -> vector<4x16x32xf32>
    "tpu.trace_stop"() : () -> ()
    %67 = vector.extract_strided_slice %66 {offsets = [0, 0, 0], sizes = [1, 16, 32], strides = [1, 1, 1]} : vector<4x16x32xf32> to vector<1x16x32xf32>
    %68 = vector.shape_cast %67 : vector<1x16x32xf32> to vector<16x32xf32>
    %69 = vector.extract_strided_slice %66 {offsets = [1, 0, 0], sizes = [1, 16, 32], strides = [1, 1, 1]} : vector<4x16x32xf32> to vector<1x16x32xf32>
    %70 = vector.shape_cast %69 : vector<1x16x32xf32> to vector<16x32xf32>
    %71 = vector.extract_strided_slice %66 {offsets = [2, 0, 0], sizes = [1, 16, 32], strides = [1, 1, 1]} : vector<4x16x32xf32> to vector<1x16x32xf32>
    %72 = vector.shape_cast %71 : vector<1x16x32xf32> to vector<16x32xf32>
    %73 = vector.extract_strided_slice %66 {offsets = [3, 0, 0], sizes = [1, 16, 32], strides = [1, 1, 1]} : vector<4x16x32xf32> to vector<1x16x32xf32>
    %74 = vector.shape_cast %73 : vector<1x16x32xf32> to vector<16x32xf32>
    %75 = tpu.concatenate %68, %70, %72, %74 in 1 : vector<16x32xf32>, vector<16x32xf32>, vector<16x32xf32>, vector<16x32xf32> -> vector<16x128xf32>
    %76 = vector.extract_strided_slice %15 {offsets = [16, 0], sizes = [16, 384], strides = [1, 1]} : vector<32x384xf32> to vector<16x384xf32>
    %77 = vector.extract_strided_slice %76 {offsets = [0, 0], sizes = [16, 128], strides = [1, 1]} : vector<16x384xf32> to vector<16x128xf32>
    %78 = vector.extract_strided_slice %77 {offsets = [0, 0], sizes = [16, 32], strides = [1, 1]} : vector<16x128xf32> to vector<16x32xf32>
    %79 = vector.shape_cast %78 : vector<16x32xf32> to vector<1x16x32xf32>
    %80 = vector.extract_strided_slice %77 {offsets = [0, 32], sizes = [16, 32], strides = [1, 1]} : vector<16x128xf32> to vector<16x32xf32>
    %81 = vector.shape_cast %80 : vector<16x32xf32> to vector<1x16x32xf32>
    %82 = vector.extract_strided_slice %77 {offsets = [0, 64], sizes = [16, 32], strides = [1, 1]} : vector<16x128xf32> to vector<16x32xf32>
    %83 = vector.shape_cast %82 : vector<16x32xf32> to vector<1x16x32xf32>
    %84 = vector.extract_strided_slice %77 {offsets = [0, 96], sizes = [16, 32], strides = [1, 1]} : vector<16x128xf32> to vector<16x32xf32>
    %85 = vector.shape_cast %84 : vector<16x32xf32> to vector<1x16x32xf32>
    %86 = tpu.concatenate %79, %81, %83, %85 in 0 : vector<1x16x32xf32>, vector<1x16x32xf32>, vector<1x16x32xf32>, vector<1x16x32xf32> -> vector<4x16x32xf32>
    %cst_19 = arith.constant 0.176776692 : f32
    %87 = vector.broadcast %cst_19 : f32 to vector<4x16x32xf32>
    %88 = arith.mulf %86, %87 : vector<4x16x32xf32>
    %89 = vector.extract_strided_slice %76 {offsets = [0, 128], sizes = [16, 128], strides = [1, 1]} : vector<16x384xf32> to vector<16x128xf32>
    %90 = vector.extract_strided_slice %89 {offsets = [0, 0], sizes = [16, 32], strides = [1, 1]} : vector<16x128xf32> to vector<16x32xf32>
    %91 = vector.shape_cast %90 : vector<16x32xf32> to vector<1x16x32xf32>
    %92 = vector.extract_strided_slice %89 {offsets = [0, 32], sizes = [16, 32], strides = [1, 1]} : vector<16x128xf32> to vector<16x32xf32>
    %93 = vector.shape_cast %92 : vector<16x32xf32> to vector<1x16x32xf32>
    %94 = vector.extract_strided_slice %89 {offsets = [0, 64], sizes = [16, 32], strides = [1, 1]} : vector<16x128xf32> to vector<16x32xf32>
    %95 = vector.shape_cast %94 : vector<16x32xf32> to vector<1x16x32xf32>
    %96 = vector.extract_strided_slice %89 {offsets = [0, 96], sizes = [16, 32], strides = [1, 1]} : vector<16x128xf32> to vector<16x32xf32>
    %97 = vector.shape_cast %96 : vector<16x32xf32> to vector<1x16x32xf32>
    %98 = tpu.concatenate %91, %93, %95, %97 in 0 : vector<1x16x32xf32>, vector<1x16x32xf32>, vector<1x16x32xf32>, vector<1x16x32xf32> -> vector<4x16x32xf32>
    %99 = vector.extract_strided_slice %76 {offsets = [0, 256], sizes = [16, 128], strides = [1, 1]} : vector<16x384xf32> to vector<16x128xf32>
    %100 = vector.extract_strided_slice %99 {offsets = [0, 0], sizes = [16, 32], strides = [1, 1]} : vector<16x128xf32> to vector<16x32xf32>
    %101 = vector.shape_cast %100 : vector<16x32xf32> to vector<1x16x32xf32>
    %102 = vector.extract_strided_slice %99 {offsets = [0, 32], sizes = [16, 32], strides = [1, 1]} : vector<16x128xf32> to vector<16x32xf32>
    %103 = vector.shape_cast %102 : vector<16x32xf32> to vector<1x16x32xf32>
    %104 = vector.extract_strided_slice %99 {offsets = [0, 64], sizes = [16, 32], strides = [1, 1]} : vector<16x128xf32> to vector<16x32xf32>
    %105 = vector.shape_cast %104 : vector<16x32xf32> to vector<1x16x32xf32>
    %106 = vector.extract_strided_slice %99 {offsets = [0, 96], sizes = [16, 32], strides = [1, 1]} : vector<16x128xf32> to vector<16x32xf32>
    %107 = vector.shape_cast %106 : vector<16x32xf32> to vector<1x16x32xf32>
    %108 = tpu.concatenate %101, %103, %105, %107 in 0 : vector<1x16x32xf32>, vector<1x16x32xf32>, vector<1x16x32xf32>, vector<1x16x32xf32> -> vector<4x16x32xf32>
    %109 = arith.truncf %88 : vector<4x16x32xf32> to vector<4x16x32xbf16>
    %110 = arith.truncf %98 : vector<4x16x32xf32> to vector<4x16x32xbf16>
    "tpu.trace_start"() <{level = 10 : i32, message = "hqe,hke->hqk"}> : () -> ()
    %cst_20 = arith.constant dense<0.000000e+00> : vector<4x16x16xf32>
    %111 = tpu.matmul %109, %110, %cst_20 {dimension_numbers = #tpu.dot_dimension_numbers<[2], [2], [1], [1], [0, 0, 0, 1, 1, 1], [0], [0]>} : vector<4x16x32xbf16>, vector<4x16x32xbf16>, vector<4x16x16xf32> -> vector<4x16x16xf32>
    "tpu.trace_stop"() : () -> ()
    %112 = vector.shape_cast %4 : vector<16x16xf32> to vector<1x16x16xf32>
    %113 = vector.broadcast %112 : vector<1x16x16xf32> to vector<4x16x16xf32>
    %114 = arith.addf %111, %113 : vector<4x16x16xf32>
    %cst_21 = arith.constant dense<0xFF800000> : vector<4x16xf32>
    %115 = vector.multi_reduction <maximumf>, %114, %cst_21 [2] : vector<4x16x16xf32> to vector<4x16xf32>
    %116 = vector.shape_cast %115 : vector<4x16xf32> to vector<4x16x1xf32>
    %117 = vector.broadcast %116 : vector<4x16x1xf32> to vector<4x16x16xf32>
    %118 = arith.subf %114, %117 : vector<4x16x16xf32>
    %119 = math.exp %118 : vector<4x16x16xf32>
    %cst_22 = arith.constant dense<0.000000e+00> : vector<4x16xf32>
    %120 = vector.multi_reduction <add>, %119, %cst_22 [2] : vector<4x16x16xf32> to vector<4x16xf32>
    %121 = vector.shape_cast %120 : vector<4x16xf32> to vector<4x16x1xf32>
    %122 = vector.broadcast %121 : vector<4x16x1xf32> to vector<4x16x16xf32>
    %123 = arith.divf %119, %122 : vector<4x16x16xf32>
    %124 = arith.truncf %123 : vector<4x16x16xf32> to vector<4x16x16xbf16>
    %125 = arith.truncf %108 : vector<4x16x32xf32> to vector<4x16x32xbf16>
    "tpu.trace_start"() <{level = 10 : i32, message = "hqk,hke->hqe"}> : () -> ()
    %cst_23 = arith.constant dense<0.000000e+00> : vector<4x16x32xf32>
    %126 = tpu.matmul %124, %125, %cst_23 {dimension_numbers = #tpu.dot_dimension_numbers<[2], [1], [1], [2], [0, 0, 0, 1, 1, 2], [0], [0]>} : vector<4x16x16xbf16>, vector<4x16x32xbf16>, vector<4x16x32xf32> -> vector<4x16x32xf32>
    "tpu.trace_stop"() : () -> ()
    %127 = vector.extract_strided_slice %126 {offsets = [0, 0, 0], sizes = [1, 16, 32], strides = [1, 1, 1]} : vector<4x16x32xf32> to vector<1x16x32xf32>
    %128 = vector.shape_cast %127 : vector<1x16x32xf32> to vector<16x32xf32>
    %129 = vector.extract_strided_slice %126 {offsets = [1, 0, 0], sizes = [1, 16, 32], strides = [1, 1, 1]} : vector<4x16x32xf32> to vector<1x16x32xf32>
    %130 = vector.shape_cast %129 : vector<1x16x32xf32> to vector<16x32xf32>
    %131 = vector.extract_strided_slice %126 {offsets = [2, 0, 0], sizes = [1, 16, 32], strides = [1, 1, 1]} : vector<4x16x32xf32> to vector<1x16x32xf32>
    %132 = vector.shape_cast %131 : vector<1x16x32xf32> to vector<16x32xf32>
    %133 = vector.extract_strided_slice %126 {offsets = [3, 0, 0], sizes = [1, 16, 32], strides = [1, 1, 1]} : vector<4x16x32xf32> to vector<1x16x32xf32>
    %134 = vector.shape_cast %133 : vector<1x16x32xf32> to vector<16x32xf32>
    %135 = tpu.concatenate %128, %130, %132, %134 in 1 : vector<16x32xf32>, vector<16x32xf32>, vector<16x32xf32>, vector<16x32xf32> -> vector<16x128xf32>
    %136 = tpu.concatenate %75, %135 in 0 : vector<16x128xf32>, vector<16x128xf32> -> vector<32x128xf32>
    %137 = arith.truncf %136 : vector<32x128xf32> to vector<32x128xbf16>
    %c0_24 = arith.constant 0 : index
    %c0_25 = arith.constant 0 : index
    %c0_26 = arith.constant 0 : index
    %138 = vector.load %arg6[%c0_24, %c0_25, %c0_26] : memref<1x128x128xbf16, #tpu.memory_space<vmem>>, vector<1x128x128xbf16>
    %139 = vector.shape_cast %138 : vector<1x128x128xbf16> to vector<128x128xbf16>
    %cst_27 = arith.constant dense<0.000000e+00> : vector<32x128xf32>
    %140 = tpu.matmul %137, %139, %cst_27 {dimension_numbers = #tpu.dot_dimension_numbers<[1], [0], [0], [1], [0, 0, 1, 1], [], []>} : vector<32x128xbf16>, vector<128x128xbf16>, vector<32x128xf32> -> vector<32x128xf32>
    %c0_28 = arith.constant 0 : index
    %c0_29 = arith.constant 0 : index
    %c0_30 = arith.constant 0 : index
    %141 = vector.load %arg7[%c0_28, %c0_29, %c0_30] : memref<1x1x128xf32, #tpu.memory_space<vmem>>, vector<1x1x128xf32>
    %142 = vector.shape_cast %141 : vector<1x1x128xf32> to vector<1x128xf32>
    %143 = vector.broadcast %142 : vector<1x128xf32> to vector<32x128xf32>
    %144 = arith.addf %140, %143 : vector<32x128xf32>
    %145 = arith.addf %7, %144 : vector<32x128xf32>
    %146 = vector.extract_strided_slice %6 {offsets = [0, 0], sizes = [1, 128], strides = [1, 1]} : vector<4x128xf32> to vector<1x128xf32>
    %147 = vector.extract_strided_slice %6 {offsets = [1, 0], sizes = [1, 128], strides = [1, 1]} : vector<4x128xf32> to vector<1x128xf32>
    %cst_31 = arith.constant dense<0.000000e+00> : vector<32xf32>
    %148 = vector.multi_reduction <add>, %145, %cst_31 [1] : vector<32x128xf32> to vector<32xf32>
    %149 = vector.shape_cast %148 : vector<32xf32> to vector<32x1xf32>
    %cst_32 = arith.constant 1.280000e+02 : f32
    %150 = vector.broadcast %cst_32 : f32 to vector<32x1xf32>
    %151 = arith.divf %149, %150 : vector<32x1xf32>
    %152 = vector.broadcast %151 : vector<32x1xf32> to vector<32x128xf32>
    %153 = arith.subf %145, %152 : vector<32x128xf32>
    %154 = arith.mulf %153, %153 : vector<32x128xf32>
    %cst_33 = arith.constant dense<0.000000e+00> : vector<32xf32>
    %155 = vector.multi_reduction <add>, %154, %cst_33 [1] : vector<32x128xf32> to vector<32xf32>
    %156 = vector.shape_cast %155 : vector<32xf32> to vector<32x1xf32>
    %cst_34 = arith.constant 1.280000e+02 : f32
    %157 = vector.broadcast %cst_34 : f32 to vector<32x1xf32>
    %158 = arith.divf %156, %157 : vector<32x1xf32>
    %159 = vector.broadcast %151 : vector<32x1xf32> to vector<32x128xf32>
    %160 = arith.subf %145, %159 : vector<32x128xf32>
    %cst_35 = arith.constant 9.99999974E-6 : f32
    %161 = vector.broadcast %cst_35 : f32 to vector<32x1xf32>
    %162 = arith.addf %158, %161 : vector<32x1xf32>
    %163 = math.rsqrt %162 : vector<32x1xf32>
    %164 = vector.broadcast %163 : vector<32x1xf32> to vector<32x128xf32>
    %165 = arith.mulf %160, %164 : vector<32x128xf32>
    %166 = vector.broadcast %146 : vector<1x128xf32> to vector<32x128xf32>
    %167 = arith.mulf %165, %166 : vector<32x128xf32>
    %168 = vector.broadcast %147 : vector<1x128xf32> to vector<32x128xf32>
    %169 = arith.addf %167, %168 : vector<32x128xf32>
    %170 = arith.truncf %169 : vector<32x128xf32> to vector<32x128xbf16>
    %c0_36 = arith.constant 0 : index
    %c0_37 = arith.constant 0 : index
    %c0_38 = arith.constant 0 : index
    %171 = vector.load %arg8[%c0_36, %c0_37, %c0_38] : memref<1x128x256xbf16, #tpu.memory_space<vmem>>, vector<1x128x256xbf16>
    %172 = vector.shape_cast %171 : vector<1x128x256xbf16> to vector<128x256xbf16>
    %cst_39 = arith.constant dense<0.000000e+00> : vector<32x256xf32>
    %173 = tpu.matmul %170, %172, %cst_39 {dimension_numbers = #tpu.dot_dimension_numbers<[1], [0], [0], [1], [0, 0, 1, 1], [], []>} : vector<32x128xbf16>, vector<128x256xbf16>, vector<32x256xf32> -> vector<32x256xf32>
    %c0_40 = arith.constant 0 : index
    %c0_41 = arith.constant 0 : index
    %c0_42 = arith.constant 0 : index
    %174 = vector.load %arg9[%c0_40, %c0_41, %c0_42] : memref<1x1x256xf32, #tpu.memory_space<vmem>>, vector<1x1x256xf32>
    %175 = vector.shape_cast %174 : vector<1x1x256xf32> to vector<1x256xf32>
    %176 = vector.broadcast %175 : vector<1x256xf32> to vector<32x256xf32>
    %177 = arith.addf %173, %176 : vector<32x256xf32>
    %cst_43 = arith.constant 0.000000e+00 : f32
    %178 = vector.broadcast %cst_43 : f32 to vector<32x256xf32>
    %179 = arith.maximumf %177, %178 : vector<32x256xf32>
    %180 = arith.truncf %179 : vector<32x256xf32> to vector<32x256xbf16>
    %c0_44 = arith.constant 0 : index
    %c0_45 = arith.constant 0 : index
    %c0_46 = arith.constant 0 : index
    %181 = vector.load %arg10[%c0_44, %c0_45, %c0_46] : memref<1x256x128xbf16, #tpu.memory_space<vmem>>, vector<1x256x128xbf16>
    %182 = vector.shape_cast %181 : vector<1x256x128xbf16> to vector<256x128xbf16>
    %cst_47 = arith.constant dense<0.000000e+00> : vector<32x128xf32>
    %183 = tpu.matmul %180, %182, %cst_47 {dimension_numbers = #tpu.dot_dimension_numbers<[1], [0], [0], [1], [0, 0, 1, 1], [], []>} : vector<32x256xbf16>, vector<256x128xbf16>, vector<32x128xf32> -> vector<32x128xf32>
    %c0_48 = arith.constant 0 : index
    %c0_49 = arith.constant 0 : index
    %c0_50 = arith.constant 0 : index
    %184 = vector.load %arg11[%c0_48, %c0_49, %c0_50] : memref<1x1x128xf32, #tpu.memory_space<vmem>>, vector<1x1x128xf32>
    %185 = vector.shape_cast %184 : vector<1x1x128xf32> to vector<1x128xf32>
    %186 = vector.broadcast %185 : vector<1x128xf32> to vector<32x128xf32>
    %187 = arith.addf %183, %186 : vector<32x128xf32>
    %188 = arith.addf %169, %187 : vector<32x128xf32>
    %189 = vector.extract_strided_slice %6 {offsets = [2, 0], sizes = [1, 128], strides = [1, 1]} : vector<4x128xf32> to vector<1x128xf32>
    %190 = vector.extract_strided_slice %6 {offsets = [3, 0], sizes = [1, 128], strides = [1, 1]} : vector<4x128xf32> to vector<1x128xf32>
    %cst_51 = arith.constant dense<0.000000e+00> : vector<32xf32>
    %191 = vector.multi_reduction <add>, %188, %cst_51 [1] : vector<32x128xf32> to vector<32xf32>
    %192 = vector.shape_cast %191 : vector<32xf32> to vector<32x1xf32>
    %cst_52 = arith.constant 1.280000e+02 : f32
    %193 = vector.broadcast %cst_52 : f32 to vector<32x1xf32>
    %194 = arith.divf %192, %193 : vector<32x1xf32>
    %195 = vector.broadcast %194 : vector<32x1xf32> to vector<32x128xf32>
    %196 = arith.subf %188, %195 : vector<32x128xf32>
    %197 = arith.mulf %196, %196 : vector<32x128xf32>
    %cst_53 = arith.constant dense<0.000000e+00> : vector<32xf32>
    %198 = vector.multi_reduction <add>, %197, %cst_53 [1] : vector<32x128xf32> to vector<32xf32>
    %199 = vector.shape_cast %198 : vector<32xf32> to vector<32x1xf32>
    %cst_54 = arith.constant 1.280000e+02 : f32
    %200 = vector.broadcast %cst_54 : f32 to vector<32x1xf32>
    %201 = arith.divf %199, %200 : vector<32x1xf32>
    %202 = vector.broadcast %194 : vector<32x1xf32> to vector<32x128xf32>
    %203 = arith.subf %188, %202 : vector<32x128xf32>
    %cst_55 = arith.constant 9.99999974E-6 : f32
    %204 = vector.broadcast %cst_55 : f32 to vector<32x1xf32>
    %205 = arith.addf %201, %204 : vector<32x1xf32>
    %206 = math.rsqrt %205 : vector<32x1xf32>
    %207 = vector.broadcast %206 : vector<32x1xf32> to vector<32x128xf32>
    %208 = arith.mulf %203, %207 : vector<32x128xf32>
    %209 = vector.broadcast %189 : vector<1x128xf32> to vector<32x128xf32>
    %210 = arith.mulf %208, %209 : vector<32x128xf32>
    %211 = vector.broadcast %190 : vector<1x128xf32> to vector<32x128xf32>
    %212 = arith.addf %210, %211 : vector<32x128xf32>
    %213 = vector.shape_cast %212 : vector<32x128xf32> to vector<2x16x128xf32>
    %c0_56 = arith.constant 0 : index
    %c0_57 = arith.constant 0 : index
    %c0_58 = arith.constant 0 : index
    %214 = vector.load %arg15[%c0_56, %c0_57, %c0_58] : memref<2x16x128xf32, #tpu.memory_space<vmem>>, vector<2x16x128xf32>
    tpu.vector_store %arg15[%c0_56, %c0_57, %c0_58], %213 {strides = array<i32>} : memref<2x16x128xf32, #tpu.memory_space<vmem>>, vector<2x16x128xf32>,
    %c1_i32 = arith.constant 1 : i32
    %215 = arith.cmpi eq, %arg1, %c1_i32 : i32
    %216 = arith.extui %215 : i1 to i32
    %c0_i32_59 = arith.constant 0 : i32
    %217 = arith.cmpi ne, %216, %c0_i32_59 : i32
    scf.if %217 {
      %c0_60 = arith.constant 0 : index
      %c0_61 = arith.constant 0 : index
      %218 = vector.load %arg13[%c0_60, %c0_61] : memref<2x128xf32, #tpu.memory_space<vmem>>, vector<2x128xf32>
      %219 = vector.extract_strided_slice %218 {offsets = [0, 0], sizes = [1, 128], strides = [1, 1]} : vector<2x128xf32> to vector<1x128xf32>
      %220 = vector.extract_strided_slice %218 {offsets = [1, 0], sizes = [1, 128], strides = [1, 1]} : vector<2x128xf32> to vector<1x128xf32>
      %cst_62 = arith.constant dense<0.000000e+00> : vector<32xf32>
      %221 = vector.multi_reduction <add>, %212, %cst_62 [1] : vector<32x128xf32> to vector<32xf32>
      %222 = vector.shape_cast %221 : vector<32xf32> to vector<32x1xf32>
      %cst_63 = arith.constant 1.280000e+02 : f32
      %223 = vector.broadcast %cst_63 : f32 to vector<32x1xf32>
      %224 = arith.divf %222, %223 : vector<32x1xf32>
      %225 = vector.broadcast %224 : vector<32x1xf32> to vector<32x128xf32>
      %226 = arith.subf %212, %225 : vector<32x128xf32>
      %227 = arith.mulf %226, %226 : vector<32x128xf32>
      %cst_64 = arith.constant dense<0.000000e+00> : vector<32xf32>
      %228 = vector.multi_reduction <add>, %227, %cst_64 [1] : vector<32x128xf32> to vector<32xf32>
      %229 = vector.shape_cast %228 : vector<32xf32> to vector<32x1xf32>
      %cst_65 = arith.constant 1.280000e+02 : f32
      %230 = vector.broadcast %cst_65 : f32 to vector<32x1xf32>
      %231 = arith.divf %229, %230 : vector<32x1xf32>
      %232 = vector.broadcast %224 : vector<32x1xf32> to vector<32x128xf32>
      %233 = arith.subf %212, %232 : vector<32x128xf32>
      %cst_66 = arith.constant 9.99999974E-6 : f32
      %234 = vector.broadcast %cst_66 : f32 to vector<32x1xf32>
      %235 = arith.addf %231, %234 : vector<32x1xf32>
      %236 = math.rsqrt %235 : vector<32x1xf32>
      %237 = vector.broadcast %236 : vector<32x1xf32> to vector<32x128xf32>
      %238 = arith.mulf %233, %237 : vector<32x128xf32>
      %239 = vector.broadcast %219 : vector<1x128xf32> to vector<32x128xf32>
      %240 = arith.mulf %238, %239 : vector<32x128xf32>
      %241 = vector.broadcast %220 : vector<1x128xf32> to vector<32x128xf32>
      %242 = arith.addf %240, %241 : vector<32x128xf32>
      %243 = vector.shape_cast %242 : vector<32x128xf32> to vector<2x16x128xf32>
      %c0_67 = arith.constant 0 : index
      %c0_68 = arith.constant 0 : index
      %c0_69 = arith.constant 0 : index
      %244 = vector.load %arg14[%c0_67, %c0_68, %c0_69] : memref<2x16x128xf32, #tpu.memory_space<vmem>>, vector<2x16x128xf32>
      tpu.vector_store %arg14[%c0_67, %c0_68, %c0_69], %243 {strides = array<i32>} : memref<2x16x128xf32, #tpu.memory_space<vmem>>, vector<2x16x128xf32>,
    } else {
    }
    return
  }
  func.func @transform_0(%arg0: i32, %arg1: i32) -> (i32, i32) {
    %c0_i32 = arith.constant 0 : i32
    %c0_i32_0 = arith.constant 0 : i32
    %c0_i32_1 = arith.constant 0 : i32
    return %c0_i32, %c0_i32_0 : i32, i32
  }
  func.func @transform_1(%arg0: i32, %arg1: i32) -> (i32, i32, i32) {
    %c0_i32 = arith.constant 0 : i32
    %c0_i32_0 = arith.constant 0 : i32
    %c0_i32_1 = arith.constant 0 : i32
    return %arg0, %c0_i32, %c0_i32_0 : i32, i32, i32
  }
  func.func @transform_2(%arg0: i32, %arg1: i32) -> (i32, i32, i32) {
    %c0_i32 = arith.constant 0 : i32
    %c0_i32_0 = arith.constant 0 : i32
    %c0_i32_1 = arith.constant 0 : i32
    return %arg1, %c0_i32, %c0_i32_0 : i32, i32, i32
  }
  func.func @transform_3(%arg0: i32, %arg1: i32) -> (i32, i32, i32) {
    %c0_i32 = arith.constant 0 : i32
    %c0_i32_0 = arith.constant 0 : i32
    %c0_i32_1 = arith.constant 0 : i32
    return %arg1, %c0_i32, %c0_i32_0 : i32, i32, i32
  }
  func.func @transform_4(%arg0: i32, %arg1: i32) -> (i32, i32, i32) {
    %c0_i32 = arith.constant 0 : i32
    %c0_i32_0 = arith.constant 0 : i32
    %c0_i32_1 = arith.constant 0 : i32
    return %arg1, %c0_i32, %c0_i32_0 : i32, i32, i32
  }
  func.func @transform_5(%arg0: i32, %arg1: i32) -> (i32, i32, i32) {
    %c0_i32 = arith.constant 0 : i32
    %c0_i32_0 = arith.constant 0 : i32
    %c0_i32_1 = arith.constant 0 : i32
    return %arg1, %c0_i32, %c0_i32_0 : i32, i32, i32
  }
  func.func @transform_6(%arg0: i32, %arg1: i32) -> (i32, i32, i32) {
    %c0_i32 = arith.constant 0 : i32
    %c0_i32_0 = arith.constant 0 : i32
    %c0_i32_1 = arith.constant 0 : i32
    return %arg1, %c0_i32, %c0_i32_0 : i32, i32, i32
  }
  func.func @transform_7(%arg0: i32, %arg1: i32) -> (i32, i32, i32) {
    %c0_i32 = arith.constant 0 : i32
    %c0_i32_0 = arith.constant 0 : i32
    %c0_i32_1 = arith.constant 0 : i32
    return %arg1, %c0_i32, %c0_i32_0 : i32, i32, i32
  }
  func.func @transform_8(%arg0: i32, %arg1: i32) -> (i32, i32, i32) {
    %c0_i32 = arith.constant 0 : i32
    %c0_i32_0 = arith.constant 0 : i32
    %c0_i32_1 = arith.constant 0 : i32
    return %arg1, %c0_i32, %c0_i32_0 : i32, i32, i32
  }
  func.func @transform_9(%arg0: i32, %arg1: i32) -> (i32, i32, i32) {
    %c0_i32 = arith.constant 0 : i32
    %c0_i32_0 = arith.constant 0 : i32
    %c0_i32_1 = arith.constant 0 : i32
    return %arg1, %c0_i32, %c0_i32_0 : i32, i32, i32
  }
  func.func @transform_10(%arg0: i32, %arg1: i32) -> (i32, i32, i32) {
    %c0_i32 = arith.constant 0 : i32
    %c0_i32_0 = arith.constant 0 : i32
    %c0_i32_1 = arith.constant 0 : i32
    return %arg1, %c0_i32, %c0_i32_0 : i32, i32, i32
  }
  func.func @transform_11(%arg0: i32, %arg1: i32) -> (i32, i32) {
    %c0_i32 = arith.constant 0 : i32
    %c0_i32_0 = arith.constant 0 : i32
    %c0_i32_1 = arith.constant 0 : i32
    return %c0_i32, %c0_i32_0 : i32, i32
  }
  func.func @transform_12(%arg0: i32, %arg1: i32) -> (i32, i32, i32) {
    %c0_i32 = arith.constant 0 : i32
    %c0_i32_0 = arith.constant 0 : i32
    %c0_i32_1 = arith.constant 0 : i32
    return %arg0, %c0_i32, %c0_i32_0 : i32, i32, i32
  }
}

</mosaic_0001>

<bundles_post_ra>
// kernel: tpu_custom_call.1
= control target key start
LH: loop header
LB: loop body
LE: loop exit
PB: predicated region body
PF: predicated region fallthrough
CT: control target
= control target key end

     0   :  { %s4810_s0 = inlined_call_operand.hbm [shape: f32[16,16], index: 0, kind: input, shape index: {}]   ;;  %s4811_s1 = inlined_call_operand.hbm [shape: f32[2,16,128], index: 1, kind: input, shape index: {}]   ;;  %s4812_s2 = inlined_call_operand.hbm [shape: bf16[2,128,384], index: 2, kind: input, shape index: {}]   ;;  %s4813_s3 = inlined_call_operand.hbm [shape: f32[2,1,384], index: 3, kind: input, shape index: {}]   ;;  %s4814_s4 = inlined_call_operand.hbm [shape: bf16[2,128,128], index: 4, kind: input, shape index: {}]   ;;  %s4815_s5 = inlined_call_operand.vmem [shape: f32[2,1,128], index: 5, kind: input, shape index: {}]   ;;  %s4816_s6 = inlined_call_operand.hbm [shape: bf16[2,128,256], index: 6, kind: input, shape index: {}]   ;;  %s4817_s7 = inlined_call_operand.vmem [shape: f32[2,1,256], index: 7, kind: input, shape index: {}]   ;;  %s4818_s8 = inlined_call_operand.hbm [shape: bf16[2,256,128], index: 8, kind: input, shape index: {}]   ;;  %s4819_s9 = inlined_call_operand.vmem [shape: f32[2,1,128], index: 9, kind: input, shape index: {}]   ;;  %s4820_s10 = inlined_call_operand.vmem [shape: f32[2,4,128], index: 10, kind: input, shape index: {}]   ;;  %s4821_s11 = inlined_call_operand.vmem [shape: f32[2,128], index: 11, kind: input, shape index: {}]   ;;  %s4822_s12 = inlined_call_operand.hbm [shape: f32[2,16,128], index: 12, kind: output, shape index: {}]  }
   0x1   :  { %4832 = sst [smem:[#allocation23_spill]] %s4810_s0 }
   0x2   :  { %4833 = sst [smem:[#allocation24_spill]] %s4811_s1 }
   0x3   :  { %4834 = sst [smem:[#allocation25_spill]] %s4812_s2 }
   0x4   :  { %4835 = sst [smem:[#allocation26_spill]] %s4815_s5 }
   0x5   :  { %4836 = sst [smem:[#allocation27_spill]] %s4817_s7 }
   0x6   :  { %4837 = sst [smem:[#allocation28_spill]] %s4819_s9 }
   0x7   :  { %4838 = sst [smem:[#allocation29_spill]] %s4820_s10 }
   0x8   :  { %4839 = sst [smem:[#allocation30_spill]] %s4821_s11 }
   0x9   :  { %4840 = sst [smem:[#allocation31_spill]] %s4822_s12 }
   0xa   :  { %17 = vsyncpa [#allocation4], 0 }
   0xb   :  { %18 = vsyncpa [#allocation7], 0 }
   0xc   :  { %19 = vsyncpa [#allocation5], 0  ;;  %s4103_s21 = smov 0   ;;  %s4105_s22 = smov 0  }
   0xd   :  { %s4107_s23 = smov 0   ;;  %s4109_s24 = smov 0  }
   0xe   :  { %s4111_s25 = smov 0   ;;  %s4113_s26 = smov 0  }
   0xf LB: > { %4841 = sst [smem:[#allocation18_spill]] %s4002_s23  ;;  %s4132_s27 = sadd.s32 4294967295, %s4014_s26   ;;  %s4014_s26 = sphi %s4113_s26, %s25_s26   ;;  %s4010_s25 = sphi %s4111_s25, %s4879_s25   ;;  %s4006_s24 = sphi %s4109_s24, %s4878_s24   ;;  %s4002_s23 = sphi %s4107_s23, %s4874_s23   ;;  %s3998_s22 = sphi %s4105_s22, %s4877_s22   ;;  %s3994_s21 = sphi %s4103_s21, %s4876_s21  }
  0x10   : > { %4842 = sst [smem:[#allocation19_spill]] %s4006_s24  ;;  %p98_p0 = scmp.ne.s32.totalorder %s4002_s23, %s3998_s22 }
  0x11   : > { %4843 = sst [smem:[#allocation20_spill]] %s4014_s26  ;;  %p99_p1 = scmp.eq.s32.totalorder %s4014_s26, 0 }
  0x12   : > { %p104_p2 = scmp.ne.s32.totalorder %s3998_s22, %s3994_s21  ;;  %p4823_p3 = scmp.eq.s32.totalorder %s4132_s27, 0 }
  0x13   : > { %p100_p4 = por %p99_p1, %p98_p0  ;;  %p3021_p5 = scmp.ge.s32.totalorder %s4014_s26, 1 }
  0x14   : > { %p4143_p6 = por %p4823_p3, %p104_p2  ;;  %p370_p7 = scmp.lt.s32.totalorder %s4014_s26, 3 }
  0x15   : > { %s4016_s13 = smov [#allocation3]   ;;  %p3404_p10 = scmp.lt.s32.totalorder %s4014_s26, 2 }
  0x16   : > { %p4148_p8 = pnand %p3021_p5, %p370_p7  ;;  %s382_s14 = sshll.u32 %s4016_s13, 4  ;;  %s383_s14 = int_to_ptr.vmem [resolvable:$true] %s382_s14 }
  0x17   : > { %p4161_p12 = pnand %p3404_p10, %p100_p4  ;;  %s34_s17 = sadd.s32 1, %s4010_s25 }
  0x18   : > { %p3379_p9 = pneg %p4148_p8  ;;  %s3747_s18 = scalar_lea.vmem %s383_s14, 256 }
  0x19   : > { %p3748_p0 = scmp.ne.s32.totalorder %s383_s14, %s3747_s18  ;;  %p3755_p5 = scmp.lt.s32.totalorder %s383_s14, %s383_s14 }
  0x1a   : > { %p4157_p11 = pnand %p3379_p9, %p4823_p3  ;;  %p3756_p7 = scmp.lt.s32.totalorder %s3747_s18, %s3747_s18 }
  0x1c   : > { %p3738_p13 = pneg %p4157_p11  ;;  %p3757_p9 = por %p3756_p7, %p3755_p5 }
  0x1e   : > { %p3750_p1 = pnand %p3748_p0, %p3738_p13 }
  0x20   : > { %p3751_p2 = pneg %p3750_p1 }
  0x22   : > { %p3758_p3 = pnand %p3757_p9, %p3751_p2 }
  0x24   : > { %3761 = shalt.err (!%p3758_p3)
}
  0x25   : > { %s4824_s19 = smov 128   ;;  %s4826_s20 = smov 8  }
  0x26   : > { %s4848_s0 = sld [smem:[#allocation23_spill]]  ;;  %p35_p4 = scmp.ge.s32.totalorder %s34_s17, 2 }
  0x27   : > { %s416_s18 = sand.u32 1, %s4014_s26   ;;  %s4181_s28 = sand.u32 1, %s4002_s23  }
  0x28   : > { %s4881_s17 = smov (%p35_p4, %s34_s17), 0  ;;  %s3351_s12 = smul.u32 192, %s4181_s28 }
  0x29   : > { %4849 = sst [smem:[#allocation21_spill]] %s4881_s17  ;;  %s88_s11 = ssub.s32 %s4010_s25, %s4881_s17 }
  0x2a   : > { %s3352_s10 = smul.u32 3072, %s4010_s25  ;;  %p89_p3 = scmp.eq.s32.totalorder %s88_s11, 0 }
  0x2b   : > { %s4850_s2 = sld [smem:[#allocation25_spill]]  ;;  %s420_s21 = scalar_lea.vmem [#allocation8], %s3351_s12 }
  0x2c   : > { %3382 = dma.hbm_to_vmem [thread:$0]  (!%p4157_p11), %s4848_s0, 256, %s383_s14, [#allocation4], %s4824_s19, %s4824_s19, %s4826_s20  }
  0x2d   : > { %s427_s14 = sshll.u32 %s420_s21, 4  ;;  %s4851_s13 = sadd.s32 1, %s4002_s23  ;;  %s428_s14 = int_to_ptr.vmem [resolvable:$true] %s427_s14 }
  0x2e   : > { %s4195_s19 = scalar_select %p89_p3, %s4002_s23, %s4851_s13  }
  0x2f   : > { %s3353_s20 = smul.u32 3, %s4181_s28  ;;  %s4198_s0 = scalar_lea.sflag [#allocation4], %s416_s18 }
  0x30   : > { %4852 = sst [smem:[#allocation22_spill]] %s4195_s19  ;;  %p4202_p10 = pneg %p4161_p12 }
  0x31   : > { %s426_s5 = scalar_lea.hbm %s4850_s2, %s3352_s10  ;;  %s3775_s11 = scalar_lea.vmem %s428_s14, 3072 }
  0x32   : > { %p3776_p0 = scmp.ne.s32.totalorder %s428_s14, %s3775_s11  ;;  %s4019_s7 = smov [#allocation8]  }
  0x33   : > { %s3780_s9 = sshll.u32 %s4019_s7, 4  ;;  %s3781_s9 = int_to_ptr.vmem [resolvable:$false] %s3780_s9 }
  0x34   : > { %p3778_p1 = pnand %p3776_p0, %p4202_p10  ;;  %s3782_s10 = scalar_lea.vmem %s3781_s9, 6144 }
  0x35   : > { %p3783_p5 = scmp.lt.s32.totalorder %s428_s14, %s3781_s9  ;;  %p3784_p7 = scmp.lt.s32.totalorder %s3782_s10, %s3775_s11 }
  0x36   : > { %p3779_p2 = pneg %p3778_p1 }
  0x37   : > { %p3785_p9 = por %p3784_p7, %p3783_p5 }
  0x39   : > { %p3786_p4 = pnand %p3785_p9, %p3779_p2 }
  0x3b   : > { %3789 = shalt.err (!%p3786_p4)
}
  0x3c   : > { %s4020_s12 = smov 192   ;;  %s4021_s18 = smov 12  }
  0x3d   : > { %3389 = dma.hbm_to_vmem [thread:$0]  (!%p4161_p12), %s426_s5, 3072, %s428_s14, %s4198_s0, %s4020_s12, %s4020_s12, %s4021_s18  }
  0x3e   : > { %s3354_s21 = smul.u32 48, %s4010_s25  ;;  %s441_s13 = scalar_lea.vmem [#allocation9], %s3353_s20 }
  0x3f   : > { %s449_s2 = sshll.u32 %s441_s13, 4  ;;  %s3027_s7 = sshll.u32 %s4181_s28, 6  ;;  %s450_s2 = int_to_ptr.vmem [resolvable:$true] %s449_s2 }
  0x40   : > { %s447_s11 = scalar_lea.hbm %s4813_s3, %s3354_s21  ;;  %s3803_s9 = scalar_lea.vmem %s450_s2, 48 }
  0x41   : > { %p3804_p3 = scmp.ne.s32.totalorder %s450_s2, %s3803_s9  ;;  %s4022_s10 = smov [#allocation9]  }
  0x42   : > { %s3808_s23 = sshll.u32 %s4022_s10, 4  ;;  %s3809_s23 = int_to_ptr.vmem [resolvable:$false] %s3808_s23 }
  0x43   : > { %p3806_p0 = pnand %p3804_p3, %p4202_p10  ;;  %s3810_s24 = scalar_lea.vmem %s3809_s23, 96 }
  0x44   : > { %p3811_p2 = scmp.lt.s32.totalorder %s450_s2, %s3809_s23  ;;  %p3812_p5 = scmp.lt.s32.totalorder %s3810_s24, %s3803_s9 }
  0x45   : > { %p3807_p1 = pneg %p3806_p0 }
  0x46   : > { %p3813_p7 = por %p3812_p5, %p3811_p2 }
  0x48   : > { %p3814_p9 = pnand %p3813_p7, %p3807_p1 }
  0x4a   : > { %3817 = shalt.err (!%p3814_p9)
}
  0x4b   : > { %3392 = dma.hbm_to_vmem [thread:$0]  (!%p4161_p12), %s447_s11, 48, %s450_s2, %s4198_s0  }
  0x4c   : > { %s3132_s5 = sshll.u32 %s4010_s25, 10  ;;  %s460_s14 = scalar_lea.vmem [#allocation10], %s3027_s7 }
  0x4d   : > { %s466_s20 = scalar_lea.hbm %s4814_s4, %s3132_s5  ;;  %s467_s12 = sshll.u32 %s460_s14, 4  ;;  %s468_s12 = int_to_ptr.vmem [resolvable:$true] %s467_s12 }
  0x4e   : > { %s3030_s23 = sshll.u32 %s4181_s28, 7  ;;  %s3831_s24 = scalar_lea.vmem %s468_s12, 1024 }
  0x4f   : > { %p3832_p4 = scmp.ne.s32.totalorder %s468_s12, %s3831_s24  ;;  %s4023_s18 = smov [#allocation10]  }
  0x50   : > { %s3836_s21 = sshll.u32 %s4023_s18, 4  ;;  %s3837_s21 = int_to_ptr.vmem [resolvable:$false] %s3836_s21 }
  0x51   : > { %p3834_p3 = pnand %p3832_p4, %p4202_p10  ;;  %s3838_s13 = scalar_lea.vmem %s3837_s21, 2048 }
  0x52   : > { %p3839_p1 = scmp.lt.s32.totalorder %s468_s12, %s3837_s21  ;;  %p3840_p2 = scmp.lt.s32.totalorder %s3838_s13, %s3831_s24 }
  0x53   : > { %p3835_p0 = pneg %p3834_p3 }
  0x54   : > { %p3841_p5 = por %p3840_p2, %p3839_p1 }
  0x56   : > { %p3842_p7 = pnand %p3841_p5, %p3835_p0 }
  0x58   : > { %3845 = shalt.err (!%p3842_p7)
}
  0x59   : > { %s4024_s2 = smov 64   ;;  %s4025_s7 = smov 4  }
  0x5a   : > { %3395 = dma.hbm_to_vmem [thread:$0]  (!%p4161_p12), %s466_s20, 1024, %s468_s12, %s4198_s0, %s4024_s2, %s4024_s2, %s4025_s7  }
  0x5b   : > { %s3133_s11 = sshll.u32 %s4010_s25, 11  ;;  %s487_s17 = scalar_lea.vmem [#allocation11], %s3030_s23 }
  0x5c   : > { %s493_s5 = scalar_lea.hbm %s4816_s6, %s3133_s11  ;;  %s494_s19 = sshll.u32 %s487_s17, 4  ;;  %s495_s19 = int_to_ptr.vmem [resolvable:$true] %s494_s19 }
  0x5d   : > { %s3859_s14 = scalar_lea.vmem %s495_s19, 2048  ;;  %s4026_s24 = smov [#allocation11]  }
  0x5e   : > { %p3860_p9 = scmp.ne.s32.totalorder %s495_s19, %s3859_s14  ;;  %s3864_s18 = sshll.u32 %s4026_s24, 4  ;;  %s3865_s18 = int_to_ptr.vmem [resolvable:$false] %s3864_s18 }
  0x5f   : > { %s3866_s21 = scalar_lea.vmem %s3865_s18, 4096  ;;  %p3867_p0 = scmp.lt.s32.totalorder %s495_s19, %s3865_s18 }
  0x60   : > { %p3862_p4 = pnand %p3860_p9, %p4202_p10  ;;  %p3868_p1 = scmp.lt.s32.totalorder %s3866_s21, %s3859_s14 }
  0x62   : > { %p3863_p3 = pneg %p3862_p4  ;;  %p3869_p2 = por %p3868_p1, %p3867_p0 }
  0x64   : > { %p3870_p5 = pnand %p3869_p2, %p3863_p3 }
  0x66   : > { %3873 = shalt.err (!%p3870_p5)
}
  0x67   : > { %s4854_s20 = smov 8   ;;  %s4855_s12 = smov 128  }
  0x68   : > { %3398 = dma.hbm_to_vmem [thread:$0]  (!%p4161_p12), %s493_s5, 2048, %s495_s19, %s4198_s0, %s4855_s12, %s4855_s12, %s4854_s20  }
  0x69   : > { %s4027_s13 = smov [#allocation6]   ;;  %s4251_s24 = scalar_lea.hbm %s4818_s8, %s3133_s11 }
  0x6a   : > { %s399_s9 = sshll.u32 %s4027_s13, 4  ;;  %s400_s9 = int_to_ptr.vmem [resolvable:$true] %s399_s9 }
  0x6b   : > { %s3885_s14 = scalar_lea.vmem %s400_s9, 512  ;;  %p3893_p3 = scmp.lt.s32.totalorder %s400_s9, %s400_s9 }
  0x6c   : > { %p3886_p7 = scmp.ne.s32.totalorder %s400_s9, %s3885_s14  ;;  %p3894_p0 = scmp.lt.s32.totalorder %s3885_s14, %s3885_s14 }
  0x6e   : > { %p3888_p9 = pnand %p3886_p7, %p3738_p13  ;;  %p3895_p1 = por %p3894_p0, %p3893_p3 }
  0x70   : > { %p3889_p4 = pneg %p3888_p9 }
  0x72   : > { %p3896_p2 = pnand %p3895_p1, %p3889_p4 }
  0x74   : > { %3899 = shalt.err (!%p3896_p2)
}
  0x75   : > { %s4856_s1 = sld [smem:[#allocation24_spill]]  ;;  %s515_s11 = scalar_lea.vmem [#allocation12], %s3030_s23 }
  0x76   : > { %s522_s18 = sshll.u32 %s515_s11, 4  ;;  %s4028_s13 = smov [#allocation12]   ;;  %s523_s18 = int_to_ptr.vmem [resolvable:$true] %s522_s18 }
  0x77   : > { %s3913_s21 = scalar_lea.vmem %s523_s18, 2048  ;;  %s3918_s15 = sshll.u32 %s4028_s13, 4  ;;  %s3919_s15 = int_to_ptr.vmem [resolvable:$false] %s3918_s15 }
  0x78   : > { %p3914_p13 = scmp.ne.s32.totalorder %s523_s18, %s3913_s21  ;;  %s3920_s10 = scalar_lea.vmem %s3919_s15, 4096 }
  0x79   : > { %p3921_p9 = scmp.lt.s32.totalorder %s523_s18, %s3919_s15  ;;  %p3922_p4 = scmp.lt.s32.totalorder %s3920_s10, %s3913_s21 }
  0x7a   : > { %p3916_p5 = pnand %p3914_p13, %p4202_p10 }
  0x7b   : > { %3385 = dma.hbm_to_vmem [thread:$0]  (!%p4157_p11), %s4856_s1, 512, %s400_s9, [#allocation7], %s4855_s12, %s4855_s12, %s4854_s20  }
  0x7c   : > { %p3917_p7 = pneg %p3916_p5  ;;  %p3923_p3 = por %p3922_p4, %p3921_p9 }
  0x7e   : > { %p3924_p0 = pnand %p3923_p3, %p3917_p7 }
  0x80   : > { %3927 = shalt.err (!%p3924_p0)
}
  0x81   : > { %3401 = dma.hbm_to_vmem [thread:$0]  (!%p4161_p12), %s4251_s24, 2048, %s523_s18, %s4198_s0, %s4024_s2, %s4024_s2, %s4025_s7  }
  0x82   : > { %547 = sbr.rel (%p4148_p8) target bundleno = 3519 (0xdbf), region = 68  ;;  %p4857_p11 = scmp.eq.s32.totalorder (!%p4148_p8), %s4132_s27, 0 }
  0x87   : > { %3977 = dma.done.wait (%p4857_p11), [#allocation4], 256   ;;  %p4858_p10 = pmov %p4857_p11 }
  0x89   : > { %3979 = vsyncadd (%p4858_p10), [#allocation4], 4294967040  ;;  %p4859_p1 = pmov %p4858_p10 }
  0x8b   : > { %3981 = dma.done.wait (%p4859_p1), [#allocation7], 512   ;;  %p4860_p2 = pmov %p4859_p1 }
  0x8c   : > { %s557_s26 = sand.u32 1, %s4132_s27   ;;  %s559_s0 = sand.u32 1, %s3998_s22  }
  0x8d   : > { %3983 = vsyncadd (%p4860_p2), [#allocation7], 4294966784  ;;  %s3355_s28 = smul.u32 192, %s559_s0  ;;  %s558_s30 = scalar_lea.sflag [#allocation4], %s557_s26 }
  0x8f   : > { %s4287_s16 = scalar_lea.vmem [#allocation8], %s3355_s28 }
  0x90   : > { %3985 = dma.done.wait (%p4143_p6), %s558_s30, 8240  }
  0x91   : > { %3987 = vsyncadd (%p4143_p6), %s558_s30, 4294959056  ;;  %s4861_s23 = sld [smem:[#allocation19_spill]]  ;;  %s3356_s2 = smul.u32 3, %s559_s0 }
  0x92   : > { %s3039_s7 = sshll.u32 %s559_s0, 6  ;;  %s3040_s20 = sshll.u32 %s559_s0, 7 }
  0x93   : > { %s4863_s11 = sld [smem:[#allocation27_spill]]  ;;  %s4317_s9 = scalar_lea.vmem [#allocation9], %s3356_s2 }
  0x94   : > { %s4864_s15 = sld [smem:[#allocation28_spill]]  ;;  %s4319_s17 = scalar_lea.vmem [#allocation10], %s3039_s7 }
  0x95   : > { %s4865_s30 = sld [smem:[#allocation29_spill]]  ;;  %s4321_s24 = scalar_lea.vmem [#allocation11], %s3040_s20 }
  0x96   : > { %s4323_s14 = scalar_lea.vmem [#allocation12], %s3040_s20 }
  0x97   : > { %p668_p8 = scmp.lt.s32.totalorder %s4861_s23, 1  ;;  %p3044_p6 = scmp.ne.s32.totalorder %s4861_s23, 0 }
  0x99   : > { %s4295_s12 = scalar_select %p668_p8, %s4861_s23, 1 }
  0x9a   : > { %687 = sbr.rel (%p3044_p6) target bundleno = 162 (0xa2), region = 100 }
  0x9b   : > { %s3042_s5 = sshll.u32 %s4295_s12, 1  ;;  %s677_s10 = scalar_lea.vmem %s4864_s15, %s4295_s12 }
  0x9c   : > { %s4305_s18 = scalar_lea.vmem %s4863_s11, %s3042_s5  ;;  %s3043_s26 = sshll.u32 %s4295_s12, 2 }
  0x9d   : > { %s4315_s1 = scalar_lea.vmem %s4865_s30, %s3043_s26 }
  0x9f   : > { %v688_v0 = vld [vmem:[#allocation6] sm:$0xff]  ;;  %v689_v1 = vld [vmem:[#allocation6 + $0x8] sm:$0xff]  ;;  %v690_v2 = vld [vmem:[#allocation6 + $0x10] sm:$0xff] }
  0xa0   : > { %692 = vst [vmem:[#allocation2 + $0x10] sm:$0xff] %v688_v0  ;;  %693 = vst [vmem:[#allocation2] sm:$0xff] %v689_v1  ;;  %v691_v3 = vld [vmem:[#allocation6 + $0x18] sm:$0xff] }
  0xa1   : > { %694 = vst [vmem:[#allocation2 + $0x18] sm:$0xff] %v690_v2  ;;  %695 = vst [vmem:[#allocation2 + $0x8] sm:$0xff] %v691_v3 }
  0xa2 PF: > { %v3564_v4 = vld [vmem:[%s4287_s16 + $0xac] ss:$12 sps:$4 sm:$0xff]   ;;  %v3566_v5 = vld [vmem:[%s4287_s16 + $0xa8] ss:$12 sps:$4 sm:$0xff]   ;;  %v4029_v6 = vmov 0   ;;  %v4030_v27 = vmov 0.0   ;;  %v739_v35 = vlaneseq }
  0xa3   : > { %914 = vmatprep.mubr.bf16.mxu0 %v4029_v6  ;;  %882 = vmatprep.subr.bf16.mxu0 %v3564_v4  ;;  %v3567_v7 = vld [vmem:[%s4287_s16 + $0x94] ss:$12 sps:$4 sm:$0xff]   ;;  %v3569_v8 = vld [vmem:[%s4287_s16 + $0x90] ss:$12 sps:$4 sm:$0xff]   ;;  %v3572_v10 = vld [vmem:[%s4287_s16 + $0x78] ss:$12 sps:$4 sm:$0xff]  }
  0xa4   : > { %883 = vmatpush1.bf16.msra.mxu0 %v3566_v5  ;;  %v3570_v9 = vld [vmem:[%s4287_s16 + $0x7c] ss:$12 sps:$4 sm:$0xff]   ;;  %v3573_v11 = vld [vmem:[%s4287_s16 + $0x64] ss:$12 sps:$4 sm:$0xff]   ;;  %v3575_v12 = vld [vmem:[%s4287_s16 + $0x60] ss:$12 sps:$4 sm:$0xff]  }
  0xa5   : > { %884 = vmatprep.subr.bf16.mxu0 %v3567_v7  ;;  %v3576_v14 = vld [vmem:[%s4287_s16 + $0x4c] ss:$12 sps:$4 sm:$0xff]   ;;  %v3578_v17 = vld [vmem:[%s4287_s16 + $0x48] ss:$12 sps:$4 sm:$0xff]   ;;  %v3581_v19 = vld [vmem:[%s4287_s16 + $0x30] ss:$12 sps:$4 sm:$0xff]  }
  0xa6   : > { %v3579_v18 = vld [vmem:[%s4287_s16 + $0x34] ss:$12 sps:$4 sm:$0xff]   ;;  %v3582_v20 = vld [vmem:[%s4287_s16 + $0x1c] ss:$12 sps:$4 sm:$0xff]   ;;  %v3584_v21 = vld [vmem:[%s4287_s16 + $0x18] ss:$12 sps:$4 sm:$0xff]  }
  0xa7   : > { %v696_v13 = vld [vmem:[#allocation2 + $0x10] sm:$0xff]  ;;  %v697_v15 = vld [vmem:[#allocation2] sm:$0xff]  ;;  %vm4031_vm0 = vmmov 0   ;;  %v4355_v37 = vshrl.u32 %v739_v35, 7  ;;  %vm1060_vm1 = vcmask 261120   ;;  %s4033_s23 = smov 64  }
  0xa8   : > { %885 = vmatpush1.bf16.msra.mxu0 %v3569_v8  ;;  %v703_v16 = vpack.c.bf16 %v697_v15, %v696_v13  ;;  %v3585_v22 = vld [vmem:[%s4287_s16 + $0x4] ss:$12 sps:$4 sm:$0xff]   ;;  %v3587_v23 = vld [vmem:[%s4287_s16] ss:$12 sps:$4 sm:$0xff]   ;;  %v699_v25 = vld [vmem:[#allocation2 + $0x8] sm:$0xff]  ;;  %s4034_s2 = smov 32  }
  0xa9   : > { %886 = vmatprep.subr.bf16.mxu0 %v3570_v9  ;;  %v698_v24 = vld [vmem:[#allocation2 + $0x18] sm:$0xff]  ;;  %v3588_v28 = vld [vmem:[%s4287_s16 + $0xb0] ss:$12 sps:$4 sm:$0xff]   ;;  %v3589_v29 = vld [vmem:[%s4287_s16 + $0x98] ss:$12 sps:$4 sm:$0xff]   ;;  %v4359_v38 = vsub.s32 0, %v4355_v37 }
  0xaa   : > { %3231 = vmatprep.mubr.bf16.mxu1 %v703_v16  ;;  %v704_v26 = vpack.c.bf16 %v699_v25, %v698_v24  ;;  %3215 = vmatprep.subr.bf16.mxu1 %v3588_v28  ;;  %v3590_v30 = vld [vmem:[%s4287_s16 + $0x80] ss:$12 sps:$4 sm:$0xff]   ;;  %v3591_v31 = vld [vmem:[%s4287_s16 + $0x68] ss:$12 sps:$4 sm:$0xff]   ;;  %v3592_v32 = vld [vmem:[%s4287_s16 + $0x50] ss:$12 sps:$4 sm:$0xff]  }
  0xab   : > { %3216 = vmatpush3.bf16.msra.mxu1 %v3588_v28  ;;  %v3593_v33 = vld [vmem:[%s4287_s16 + $0x38] ss:$12 sps:$4 sm:$0xff]   ;;  %v3594_v34 = vld [vmem:[%s4287_s16 + $0x20] ss:$12 sps:$4 sm:$0xff]   ;;  %v3595_v36 = vld [vmem:[%s4287_s16 + $0x8] ss:$12 sps:$4 sm:$0xff]  }
  0xac   : > { %887 = vmatpush1.bf16.msra.mxu0 %v3572_v10  ;;  %3217 = vmatprep.subr.bf16.mxu1 %v3589_v29  ;;  %v4362_v39 = vsub.s32 1, %v4355_v37  ;;  %v4365_v40 = vld [vmem:[%s4317_s9] sm:$0x7]  ;;  %s4032_s16 = smov 96   ;;  %vm1249_vm2 = vcmask 130048   ;;  %vm1548_vm3 = vcmask 523264  }
  0xad   : > { %888 = vmatprep.subr.bf16.mxu0 %v3573_v11  ;;  %v4371_v43 = vrot.slane %v4365_v40, %v4359_v38  ;;  %vm1551_vm4 = vcmask 785408   ;;  %s4866_s5 = sld [smem:[#allocation26_spill]] }
  0xae   : > { %v4375_v44 = vrot.slane %v4365_v40, %v4362_v39 }
  0xaf   : > { %3218 = vmatpush3.bf16.msra.mxu1 %v3589_v29  ;;  %v749_v29 = vsub.s32 2, %v4355_v37 }
  0xb0   : > { %889 = vmatpush1.bf16.msra.mxu0 %v3575_v12  ;;  %3219 = vmatprep.subr.bf16.mxu1 %v3590_v30 }
  0xb1   : > { %890 = vmatprep.subr.bf16.mxu0 %v3576_v14 }
  0xb3   : > { %3220 = vmatpush3.bf16.msra.mxu1 %v3590_v30  ;;  %s4867_s19 = scalar_lea.vmem %s4866_s5, %s4295_s12  ;;  %s4869_s12 = sld [smem:[#allocation19_spill]] }
  0xb4   : > { %891 = vmatpush1.bf16.msra.mxu0 %v3578_v17  ;;  %3221 = vmatprep.subr.bf16.mxu1 %v3591_v31 }
  0xb5   : > { %892 = vmatprep.subr.bf16.mxu0 %v3579_v18 }
  0xb7   : > { %3222 = vmatpush3.bf16.msra.mxu1 %v3591_v31 }
  0xb8   : > { %893 = vmatpush1.bf16.msra.mxu0 %v3581_v19  ;;  %3223 = vmatprep.subr.bf16.mxu1 %v3592_v32 }
  0xb9   : > { %894 = vmatprep.subr.bf16.mxu0 %v3582_v20  ;;  %p3127_p12 = scmp.ne.s32.totalorder %s4869_s12, 1 }
  0xba   : > { %s4870_s21 = sld [smem:[#allocation30_spill]] (!%p3127_p12) }
  0xbb   : > { %3224 = vmatpush3.bf16.msra.mxu1 %v3592_v32  ;;  %v750_v32 = vrot.slane %v4365_v40, %v749_v29 }
  0xbc   : > { %895 = vmatpush1.bf16.msra.mxu0 %v3584_v21  ;;  %3225 = vmatprep.subr.bf16.mxu1 %v3593_v33 }
  0xbd   : > { %896 = vmatprep.subr.bf16.mxu0 %v3585_v22 }
  0xbf   : > { %3226 = vmatpush3.bf16.msra.mxu1 %v3593_v33 }
  0xc0   : > { %897 = vmatpush1.bf16.msra.mxu0 %v3587_v23  ;;  %3227 = vmatprep.subr.bf16.mxu1 %v3594_v34 }
  0xc1   : > { %3235 = vmatprep.subr.bf16.mxu0 %v4030_v27 }
  0xc3   : > { %915 = vmatmul.mubr.bf16.vlgmr.msra.gmra.mxu0 %v703_v16  ;;  %3228 = vmatpush3.bf16.msra.mxu1 %v3594_v34 }
  0xc4   : > { %924 = vmatprep.mubr.bf16.mxu0 %v4029_v6  ;;  %3229 = vmatprep.subr.bf16.mxu1 %v3595_v36 }
  0xc7   : > { %3230 = vmatpush3.bf16.msra.mxu1 %v3595_v36 }
  0xc8   : > { %3247 = vmatprep.subr.bf16.mxu1 %v4030_v27 }
  0xca   : > { %3232 = vmatmul.mubr.bf16.vlgmr.msra.gmra.mxu1 %v704_v26 }
  0xcb   : > { %925 = vmatmul.mubr.bf16.gmra.mxu0 %v704_v26  ;;  %3249 = vmatprep.mubr.msk.bf16.mxu1 %vm4031_vm0, %v4030_v27 }
  0xcc   : > { %3237 = vmatprep.mubr.msk.bf16.mxu0 %vm4031_vm0, %v4030_v27 }
 0x183   : > { %v916_v41 = vpop.f32.mrf.mxu0 }
 0x184   : > { %v917_v53 = vadd.f32 %v916_v41, %v4371_v43 }
 0x185   : > { %v918_v42 = vpop.f32.mrf.mxu0 }
 0x186   : > { %v919_v48 = vadd.f32 %v918_v42, %v4375_v44  ;;  %v1004_v55 = vmul.f32 0.17677669, %v917_v53 }
 0x187   : > { %v920_v45 = vpop.f32.mrf.mxu0 }
 0x188   : > { %v921_v46 = vadd.f32 %v920_v45, %v4371_v43 }
 0x189   : > { %v922_v47 = vpop.f32.mrf.mxu0 }
 0x18a   : > { %v923_v49 = vadd.f32 %v922_v47, %v4375_v44  ;;  %988 = vrot.lane.b32.xlu1 %v921_v46, %s4032_s16  ;;  %v1005_v54 = vmul.f32 0.17677669, %v921_v46  ;;  %v3233_v35 = vpop.f32.mrf.mxu1 }
 0x18b   : > { %v4410_v24 = vpop.f32.mrf.mxu0  ;;  %v4430_v36 = vadd.f32 %v3233_v35, %v750_v32 }
 0x18c   : > { %v3479_v50 = vpack.i.bf16 %v923_v49, %v919_v48  ;;  %v1056_v51 = vpack.c.bf16 %v923_v49, %v919_v48  ;;  %v1052_v56 = vpack.c.bf16 %v1005_v54, %v1004_v55  ;;  %v969_v41 = vpop.f32.mrf.mxu1  ;;  %v4444_v55 = vld [vmem:[#allocation3 + $0x8] sm:$0xff] }
 0x18d   : > { %v928_v25 = vpop.f32.mrf.mxu0 }
 0x18e   : > { %3480 = vrot.lane.b32.xlu1 %v3479_v50, %s4033_s23  ;;  %3475 = vrot.lane.b32.xlu0 %v3479_v50, %s4032_s16  ;;  %v1065_v52 = vsel %vm1060_vm1, %v1056_v51, 0  ;;  %v4416_v30 = vadd.f32 %v928_v25, %v4375_v44  ;;  %v3234_v42 = vpop.f32.mrf.mxu1  ;;  %v4441_v51 = vld [vmem:[#allocation3] sm:$0xff] }
 0x18f   : > { %3236 = vmatpush3.bf16.xpose.msra.mxu0 %v1065_v52  ;;  %v4412_v26 = vpop.f32.mrf.mxu0  ;;  %v4432_v45 = vadd.f32 %v3234_v42, %v750_v32 }
 0x190   : > { %3241 = vmatprep.subr.bf16.mxu0 %v4030_v27 }
 0x191   : > { %v932_v28 = vpop.f32.mrf.mxu0  ;;  %v1910_v40 = vpack.c.bf16 %v4432_v45, %v4430_v36 }
 0x192   : > { %992 = vrot.lane.b32.xlu1 %v917_v53, %s4033_s23  ;;  %986 = vrot.lane.b32.xlu0 %v917_v53, %s4032_s16  ;;  %v4419_v31 = vadd.f32 %v932_v28, %v4375_v44  ;;  %v970_v44 = vadd.f32 %v969_v41, %v750_v32 }
 0x194   : > { %v4426_v33 = vpack.i.bf16 %v4419_v31, %v4416_v30  ;;  %v1626_v34 = vpack.c.bf16 %v4419_v31, %v4416_v30 }
 0x196   : > { %998 = vrot.lane.b32.xlu1 %v917_v53, %s4034_s2  ;;  %3485 = vrot.lane.b32.xlu0 %v3479_v50, %s4034_s2  ;;  %v4438_v50 = vpack.i.bf16 %v4432_v45, %v4430_v36 }
 0x197   : > { %3238 = vmatmul.mubr.msk.bf16.vlgmr.msra.gmra.mxu0 %vm1060_vm1, %v1052_v56 }
 0x198   : > { %3243 = vmatprep.mubr.msk.bf16.mxu0 %vm4031_vm0, %v4030_v27 }
 0x19a   : > { %994 = vrot.lane.b32.xlu0 %v921_v46, %s4033_s23 }
 0x19e   : > { %1000 = vrot.lane.b32.xlu0 %v921_v46, %s4034_s2  ;;  %v972_v46 = vpop.f32.mrf.mxu1 }
 0x19f   : > { %v973_v47 = vadd.f32 %v972_v46, %v750_v32 }
 0x1a1   : > { %v1342_v48 = vpack.c.bf16 %v973_v47, %v970_v44  ;;  %v3494_v49 = vpack.i.bf16 %v973_v47, %v970_v44 }
 0x1fc   : > { %v989_v57 = vpop.permute.xlu1 %988 }
 0x1fd   : > { %v1007_v9 = vmul.f32 0.17677669, %v989_v57 }
 0x200   : > { %v3481_v58 = vpop.permute.xlu1 %3480  ;;  %v3476_v59 = vpop.permute.xlu0 %3475 }
 0x201   : > { %v3483_v60 = vunpack.i.h.bf16 %v3481_v58  ;;  %v3482_v61 = vunpack.i.l.bf16 %v3481_v58  ;;  %v3478_v62 = vunpack.i.h.bf16 %v3476_v59  ;;  %v3477_v63 = vunpack.i.l.bf16 %v3476_v59 }
 0x203   : > { %v1058_v0 = vpack.c.bf16 %v3483_v60, %v3482_v61  ;;  %v1057_v1 = vpack.c.bf16 %v3478_v62, %v3477_v63 }
 0x204   : > { %v987_v2 = vpop.permute.xlu0 %986  ;;  %v993_v7 = vpop.permute.xlu1 %992 }
 0x205   : > { %v1112_v3 = vsel %vm1060_vm1, %v1057_v1, 0  ;;  %v1159_v4 = vsel %vm1060_vm1, %v1058_v0, 0  ;;  %v1006_v5 = vmul.f32 0.17677669, %v987_v2  ;;  %v1008_v15 = vmul.f32 0.17677669, %v993_v7 }
 0x206   : > { %3242 = vmatpush3.bf16.xpose.msra.mxu0 %v1112_v3  ;;  %3248 = vmatpush3.bf16.xpose.msra.mxu1 %v1159_v4 }
 0x207   : > { %3253 = vmatprep.subr.bf16.mxu0 %v4030_v27  ;;  %3259 = vmatprep.subr.bf16.mxu1 %v4030_v27  ;;  %v1053_v12 = vpack.c.bf16 %v1007_v9, %v1006_v5 }
 0x208   : > { %v3486_v8 = vpop.permute.xlu0 %3485  ;;  %v999_v18 = vpop.permute.xlu1 %998 }
 0x209   : > { %v3488_v10 = vunpack.i.h.bf16 %v3486_v8  ;;  %v3487_v11 = vunpack.i.l.bf16 %v3486_v8  ;;  %v1010_v21 = vmul.f32 0.17677669, %v999_v18 }
 0x20b   : > { %v1059_v13 = vpack.c.bf16 %v3488_v10, %v3487_v11 }
 0x20c   : > { %v995_v14 = vpop.permute.xlu0 %994 }
 0x20d   : > { %v1009_v16 = vmul.f32 0.17677669, %v995_v14  ;;  %3244 = vmatmul.mubr.msk.bf16.vlgmr.msra.gmra.mxu0 %vm1060_vm1, %v1053_v12  ;;  %v1206_v17 = vsel %vm1060_vm1, %v1059_v13, 0 }
 0x20e   : > { %3254 = vmatpush3.bf16.xpose.msra.mxu0 %v1206_v17  ;;  %3255 = vmatprep.mubr.msk.bf16.mxu0 %vm4031_vm0, %v4030_v27 }
 0x20f   : > { %v1054_v19 = vpack.c.bf16 %v1009_v16, %v1008_v15  ;;  %3265 = vmatprep.subr.bf16.mxu0 %v4030_v27 }
 0x210   : > { %v1001_v20 = vpop.permute.xlu0 %1000 }
 0x211   : > { %v1011_v22 = vmul.f32 0.17677669, %v1001_v20  ;;  %3250 = vmatmul.mubr.msk.bf16.vlgmr.msra.gmra.mxu1 %vm1060_vm1, %v1054_v19 }
 0x212   : > { %3261 = vmatprep.mubr.msk.bf16.mxu1 %vm4031_vm0, %v4030_v27  ;;  %3260 = vmatpush3.bf16.msra.mxu1 %v1342_v48 }
 0x213   : > { %v1055_v23 = vpack.c.bf16 %v1011_v22, %v1010_v21  ;;  %3271 = vmatprep.subr.bf16.mxu1 %v4030_v27  ;;  %v4468_v22 = vadd.f32 %v4410_v24, %v4371_v43 }
 0x215   : > { %3256 = vmatmul.mubr.msk.bf16.vlgmr.msra.gmra.mxu0 %vm1060_vm1, %v1055_v23 }
 0x216   : > { %3267 = vmatprep.mubr.msk.bf16.mxu0 %vm4031_vm0, %v4030_v27 }
 0x257   : > { %v1101_v52 = vpop.f32.mrf.mxu0 }
 0x258   : > { %v1102_v53 = vadd.f32 %v1101_v52, %v4441_v51 }
 0x259   : > { %v3239_v54 = vpop.f32.mrf.mxu0 }
 0x25a   : > { %v1250_v56 = vsel %vm1249_vm2, %v1102_v53, -inf }
 0x25b   : > { %1251 = vmax.xlane.f32.xlu1 %v1250_v56  ;;  %v1104_v57 = vpop.f32.mrf.mxu0 }
 0x25c   : > { %v1105_v58 = vadd.f32 %v1104_v57, %v4444_v55 }
 0x25d   : > { %v3240_v59 = vpop.f32.mrf.mxu0 }
 0x25e   : > { %v1253_v60 = vsel %vm1249_vm2, %v1105_v58, -inf }
 0x25f   : > { %1254 = vmax.xlane.f32.xlu0 %v1253_v60 }
 0x2cd   : > { %v1148_v61 = vpop.f32.mrf.mxu0 }
 0x2ce   : > { %v1149_v62 = vadd.f32 %v1148_v61, %v4441_v51 }
 0x2cf   : > { %v3245_v63 = vpop.f32.mrf.mxu0 }
 0x2d0   : > { %v1256_v0 = vsel %vm1249_vm2, %v1149_v62, -inf }
 0x2d1   : > { %v1195_v1 = vpop.f32.mrf.mxu1  ;;  %1257 = vmax.xlane.f32.xlu0 %v1256_v0  ;;  %v1151_v2 = vpop.f32.mrf.mxu0 }
 0x2d2   : > { %v1196_v3 = vadd.f32 %v1195_v1, %v4441_v51  ;;  %v1152_v4 = vadd.f32 %v1151_v2, %v4444_v55 }
 0x2d3   : > { %v3246_v5 = vpop.f32.mrf.mxu0  ;;  %v3251_v7 = vpop.f32.mrf.mxu1 }
 0x2d4   : > { %v1262_v8 = vsel %vm1249_vm2, %v1196_v3, -inf  ;;  %v1259_v9 = vsel %vm1249_vm2, %v1152_v4, -inf }
 0x2d5   : > { %v1198_v10 = vpop.f32.mrf.mxu1  ;;  %1263 = vmax.xlane.f32.xlu0 %v1262_v8  ;;  %1260 = vmax.xlane.f32.xlu1 %v1259_v9  ;;  %v1242_v11 = vpop.f32.mrf.mxu0 }
 0x2d6   : > { %v1199_v12 = vadd.f32 %v1198_v10, %v4444_v55  ;;  %v1243_v13 = vadd.f32 %v1242_v11, %v4441_v51 }
 0x2d7   : > { %v3252_v14 = vpop.f32.mrf.mxu1  ;;  %v3257_v15 = vpop.f32.mrf.mxu0 }
 0x2d8   : > { %v1265_v16 = vsel %vm1249_vm2, %v1199_v12, -inf  ;;  %v1268_v17 = vsel %vm1249_vm2, %v1243_v13, -inf }
 0x2d9   : > { %1266 = vmax.xlane.f32.xlu1 %v1265_v16  ;;  %1269 = vmax.xlane.f32.xlu0 %v1268_v17  ;;  %v1245_v18 = vpop.f32.mrf.mxu0 }
 0x2da   : > { %v1246_v19 = vadd.f32 %v1245_v18, %v4444_v55 }
 0x2db   : > { %v3258_v20 = vpop.f32.mrf.mxu0 }
 0x2dc   : > { %v1271_v21 = vsel %vm1249_vm2, %v1246_v19, -inf }
 0x2dd   : > { %1272 = vmax.xlane.f32.xlu1 %v1271_v21  ;;  %v4504_v21 = vadd.f32 %v4412_v26, %v4371_v43 }
 0x2e4   : > { %v1252_v23 = vpop.xlane.xlu1 %1251 }
 0x2e5   : > { %v1274_v25 = vsub.f32 %v1102_v53, %v1252_v23 }
 0x2e7   : > { %v1282_v28 = vmul.f32 1.442695, %v1274_v25 }
 0x2e8   : > { %v1255_v32 = vpop.xlane.xlu0 %1254 }
 0x2e9   : > { %3644 = vpow2.f32 %v1282_v28  ;;  %v1275_v35 = vsub.f32 %v1105_v58, %v1255_v32 }
 0x2eb   : > { %v1284_v41 = vmul.f32 1.442695, %v1275_v35 }
 0x2ed   : > { %3646 = vpow2.f32 %v1284_v41 }
 0x2ee   : > { %3495 = vrot.lane.b32.xlu1 %v3494_v49, %s4033_s23 }
 0x2ef   : > { %3490 = vrot.lane.b32.xlu0 %v3494_v49, %s4032_s16 }
 0x2f2   : > { %3500 = vrot.lane.b32.xlu1 %v3494_v49, %s4034_s2 }
 0x2f3   : > { %3505 = vrot.lane.b32.xlu0 %v4426_v33, %s4032_s16 }
 0x2f6   : > { %1556 = vrot.lane.b32.xlu1 %v4468_v22, %s4032_s16  ;;  %v4472_v42 = vpop.eup %3644 }
 0x2f7   : > { %v1298_v44 = vsel %vm1249_vm2, %v4472_v42, 0.0 }
 0x2fa   : > { %v4476_v46 = vpop.eup %3646 }
 0x2fb   : > { %v1301_v24 = vsel %vm1249_vm2, %v4476_v46, 0.0 }
 0x312   : > { %1299 = vadd.xlane.f32.xlu0 %v1298_v44 }
 0x31a   : > { %1302 = vadd.xlane.f32.xlu1 %v1301_v24 }
 0x35a   : > { %v1258_v47 = vpop.xlane.xlu0 %1257 }
 0x35b   : > { %v1276_v48 = vsub.f32 %v1149_v62, %v1258_v47 }
 0x35d   : > { %v1286_v49 = vmul.f32 1.442695, %v1276_v48 }
 0x35e   : > { %v1264_v52 = vpop.xlane.xlu0 %1263  ;;  %v1261_v53 = vpop.xlane.xlu1 %1260 }
 0x35f   : > { %3648 = vpow2.f32 %v1286_v49  ;;  %v1278_v54 = vsub.f32 %v1196_v3, %v1264_v52  ;;  %v1277_v56 = vsub.f32 %v1152_v4, %v1261_v53 }
 0x361   : > { %v1290_v57 = vmul.f32 1.442695, %v1278_v54  ;;  %v1288_v58 = vmul.f32 1.442695, %v1277_v56 }
 0x362   : > { %v1267_v59 = vpop.xlane.xlu1 %1266  ;;  %v1270_v60 = vpop.xlane.xlu0 %1269 }
 0x363   : > { %3650 = vpow2.f32 %v1290_v57  ;;  %v1279_v61 = vsub.f32 %v1199_v12, %v1267_v59  ;;  %v1280_v63 = vsub.f32 %v1243_v13, %v1270_v60 }
 0x364   : > { %3652 = vpow2.f32 %v1288_v58 }
 0x365   : > { %v1292_v0 = vmul.f32 1.442695, %v1279_v61  ;;  %v1294_v1 = vmul.f32 1.442695, %v1280_v63 }
 0x366   : > { %v3491_v2 = vpop.permute.xlu0 %3490  ;;  %v1273_v5 = vpop.xlane.xlu1 %1272 }
 0x367   : > { %3654 = vpow2.f32 %v1292_v0  ;;  %v3493_v62 = vunpack.i.h.bf16 %v3491_v2  ;;  %v3492_v7 = vunpack.i.l.bf16 %v3491_v2  ;;  %v1281_v8 = vsub.f32 %v1246_v19, %v1273_v5 }
 0x368   : > { %3656 = vpow2.f32 %v1294_v1 }
 0x369   : > { %v1343_v9 = vpack.c.bf16 %v3493_v62, %v3492_v7  ;;  %v1296_v3 = vmul.f32 1.442695, %v1281_v8 }
 0x36a   : > { %v3496_v23 = vpop.permute.xlu1 %3495  ;;  %v3506_v26 = vpop.permute.xlu0 %3505 }
 0x36b   : > { %3658 = vpow2.f32 %v1296_v3  ;;  %3266 = vmatpush3.bf16.msra.mxu0 %v1343_v9  ;;  %v3498_v41 = vunpack.i.h.bf16 %v3496_v23  ;;  %v3497_v44 = vunpack.i.l.bf16 %v3496_v23  ;;  %v3508_v7 = vunpack.i.h.bf16 %v3506_v26 }
 0x36c   : > { %v4480_v4 = vpop.eup %3648  ;;  %3277 = vmatprep.subr.bf16.mxu0 %v4030_v27  ;;  %v3507_v8 = vunpack.i.l.bf16 %v3506_v26  ;;  %v1574_v26 = vmul.f32 0.17677669, %v4468_v22 }
 0x36d   : > { %v1304_v10 = vsel %vm1249_vm2, %v4480_v4, 0.0  ;;  %v1344_v49 = vpack.c.bf16 %v3498_v41, %v3497_v44 }
 0x36e   : > { %1305 = vadd.xlane.f32.xlu0 %v1304_v10  ;;  %v3501_v43 = vpop.permute.xlu1 %3500 }
 0x36f   : > { %v3503_v59 = vunpack.i.h.bf16 %v3501_v43  ;;  %v3502_v60 = vunpack.i.l.bf16 %v3501_v43 }
 0x370   : > { %v4485_v11 = vpop.eup %3650 }
 0x371   : > { %v3653_v12 = vpop.eup %3652  ;;  %v1310_v13 = vsel %vm1249_vm2, %v4485_v11, 0.0  ;;  %v1345_v5 = vpack.c.bf16 %v3503_v59, %v3502_v60 }
 0x372   : > { %1311 = vadd.xlane.f32.xlu0 %v1310_v13  ;;  %v1307_v14 = vsel %vm1249_vm2, %v3653_v12, 0.0  ;;  %v4520_v25 = vpop.permute.xlu1 %1556 }
 0x373   : > { %1308 = vadd.xlane.f32.xlu1 %v1307_v14 }
 0x374   : > { %v4490_v15 = vpop.eup %3654 }
 0x375   : > { %v4492_v16 = vpop.eup %3656  ;;  %v1313_v17 = vsel %vm1249_vm2, %v4490_v15, 0.0 }
 0x376   : > { %v1316_v18 = vsel %vm1249_vm2, %v4492_v16, 0.0 }
 0x377   : > { %1317 = vadd.xlane.f32.xlu0 %v1316_v18  ;;  %1314 = vadd.xlane.f32.xlu1 %v1313_v17  ;;  %v1627_v17 = vpack.c.bf16 %v3508_v7, %v3507_v8 }
 0x378   : > { %v4498_v19 = vpop.eup %3658 }
 0x379   : > { %v1319_v20 = vsel %vm1249_vm2, %v4498_v19, 0.0 }
 0x37b   : > { %1320 = vadd.xlane.f32.xlu1 %v1319_v20 }
 0x38c   : > { %3510 = vrot.lane.b32.xlu1 %v4426_v33, %s4033_s23 }
 0x38d   : > { %1558 = vrot.lane.b32.xlu0 %v4504_v21, %s4032_s16 }
 0x390   : > { %1562 = vrot.lane.b32.xlu1 %v4468_v22, %s4033_s23 }
 0x391   : > { %3515 = vrot.lane.b32.xlu0 %v4426_v33, %s4034_s2 }
 0x394   : > { %1568 = vrot.lane.b32.xlu1 %v4468_v22, %s4034_s2 }
 0x395   : > { %1564 = vrot.lane.b32.xlu0 %v4504_v21, %s4033_s23 }
 0x399   : > { %1570 = vrot.lane.b32.xlu0 %v4504_v21, %s4034_s2 }
 0x39b   : > { %v1300_v28 = vpop.xlane.xlu0 %1299 }
 0x39c   : > { %3660 = vrcp.f32 %v1300_v28 }
 0x3a3   : > { %v1303_v32 = vpop.xlane.xlu1 %1302 }
 0x3a4   : > { %3662 = vrcp.f32 %v1303_v32  ;;  %v1681_v32 = vsel %vm1060_vm1, %v1627_v17, 0 }
 0x3a9   : > { %v3661_v35 = vpop.eup %3660 }
 0x3aa   : > { %v1323_v24 = vmul.f32 %v3661_v35, %v4472_v42 }
 0x3b1   : > { %v3663_v33 = vpop.eup %3662 }
 0x3b2   : > { %v1325_v47 = vmul.f32 %v3663_v33, %v4476_v46 }
 0x3b4   : > { %v1338_v48 = vpack.c.bf16 %v1325_v47, %v1323_v24 }
 0x3b6   : > { %3262 = vmatmul.mubr.msk.bf16.vlgmr.msra.gmra.mxu1 %vm1249_vm2, %v1338_v48 }
 0x3b7   : > { %3272 = vmatpush3.bf16.msra.mxu1 %v1344_v49  ;;  %3273 = vmatprep.mubr.msk.bf16.mxu1 %vm4031_vm0, %v4030_v27 }
 0x3b8   : > { %3283 = vmatprep.subr.bf16.mxu1 %v4030_v27 }
 0x3f7   : > { %v1306_v52 = vpop.xlane.xlu0 %1305 }
 0x3f8   : > { %3664 = vrcp.f32 %v1306_v52 }
 0x3fb   : > { %v1312_v53 = vpop.xlane.xlu0 %1311 }
 0x3fc   : > { %v1309_v54 = vpop.xlane.xlu1 %1308 }
 0x3fd   : > { %3666 = vrcp.f32 %v1309_v54 }
 0x3fe   : > { %3668 = vrcp.f32 %v1312_v53 }
 0x400   : > { %v1318_v56 = vpop.xlane.xlu0 %1317  ;;  %v1315_v42 = vpop.xlane.xlu1 %1314 }
 0x401   : > { %3670 = vrcp.f32 %v1315_v42 }
 0x402   : > { %3672 = vrcp.f32 %v1318_v56 }
 0x404   : > { %v1321_v46 = vpop.xlane.xlu1 %1320  ;;  %v1559_v0 = vpop.permute.xlu0 %1558 }
 0x405   : > { %3674 = vrcp.f32 %v1321_v46  ;;  %v3665_v57 = vpop.eup %3664  ;;  %v1577_v35 = vmul.f32 0.17677669, %v1559_v0 }
 0x406   : > { %v1327_v61 = vmul.f32 %v3665_v57, %v4480_v4 }
 0x408   : > { %v3511_v4 = vpop.permute.xlu1 %3510  ;;  %v3516_v13 = vpop.permute.xlu0 %3515 }
 0x409   : > { %v3513_v23 = vunpack.i.h.bf16 %v3511_v4  ;;  %v3512_v43 = vunpack.i.l.bf16 %v3511_v4  ;;  %v3517_v28 = vunpack.i.l.bf16 %v3516_v13 }
 0x40a   : > { %v3667_v58 = vpop.eup %3666 }
 0x40b   : > { %v1329_v63 = vmul.f32 %v3667_v58, %v3653_v12  ;;  %v3669_v1 = vpop.eup %3668  ;;  %v1628_v30 = vpack.c.bf16 %v3513_v23, %v3512_v43 }
 0x40c   : > { %v1331_v3 = vmul.f32 %v3669_v1, %v4485_v11  ;;  %v1634_v11 = vsel %vm1060_vm1, %v1626_v34, 0  ;;  %v1565_v31 = vpop.permute.xlu0 %1564  ;;  %v1563_v34 = vpop.permute.xlu1 %1562 }
 0x40d   : > { %v1339_v2 = vpack.c.bf16 %v1329_v63, %v1327_v61  ;;  %v1728_v41 = vsel %vm1060_vm1, %v1628_v30, 0  ;;  %v1579_v24 = vmul.f32 0.17677669, %v1565_v31  ;;  %v1578_v47 = vmul.f32 0.17677669, %v1563_v34 }
 0x40e   : > { %v3671_v62 = vpop.eup %3670 }
 0x40f   : > { %3268 = vmatmul.mubr.msk.bf16.vlgmr.msra.gmra.mxu0 %vm1249_vm2, %v1339_v2  ;;  %v3673_v9 = vpop.eup %3672  ;;  %v1333_v10 = vmul.f32 %v3671_v62, %v4490_v15  ;;  %v1624_v54 = vpack.c.bf16 %v1579_v24, %v1578_v47 }
 0x410   : > { %3278 = vmatpush3.bf16.msra.mxu0 %v1345_v5  ;;  %3279 = vmatprep.mubr.msk.bf16.mxu0 %vm4031_vm0, %v4030_v27  ;;  %v1335_v18 = vmul.f32 %v3673_v9, %v4492_v16  ;;  %v1575_v16 = vmul.f32 0.17677669, %v4504_v21  ;;  %v1576_v21 = vmul.f32 0.17677669, %v4520_v25  ;;  %v1571_v48 = vpop.permute.xlu0 %1570  ;;  %v1569_v49 = vpop.permute.xlu1 %1568 }
 0x411   : > { %3289 = vmatprep.subr.bf16.mxu0 %v4030_v27  ;;  %v1340_v14 = vpack.c.bf16 %v1333_v10, %v1331_v3  ;;  %v1581_v52 = vmul.f32 0.17677669, %v1571_v48  ;;  %v1580_v53 = vmul.f32 0.17677669, %v1569_v49 }
 0x412   : > { %v3675_v12 = vpop.eup %3674  ;;  %v1622_v22 = vpack.c.bf16 %v1575_v16, %v1574_v26  ;;  %v1623_v44 = vpack.c.bf16 %v1577_v35, %v1576_v21 }
 0x413   : > { %v1337_v20 = vmul.f32 %v3675_v12, %v4498_v19  ;;  %3274 = vmatmul.mubr.msk.bf16.vlgmr.msra.gmra.mxu1 %vm1249_vm2, %v1340_v14  ;;  %v3518_v19 = vunpack.i.h.bf16 %v3516_v13  ;;  %v1625_v56 = vpack.c.bf16 %v1581_v52, %v1580_v53 }
 0x414   : > { %3284 = vmatpush3.bf16.xpose.msra.mxu1 %v1634_v11  ;;  %3285 = vmatprep.mubr.msk.bf16.mxu1 %vm4031_vm0, %v4030_v27 }
 0x415   : > { %v1341_v15 = vpack.c.bf16 %v1337_v20, %v1335_v18  ;;  %3295 = vmatprep.subr.bf16.mxu1 %v4030_v27  ;;  %v1629_v33 = vpack.c.bf16 %v3518_v19, %v3517_v28 }
 0x417   : > { %3280 = vmatmul.mubr.msk.bf16.vlgmr.msra.gmra.mxu0 %vm1249_vm2, %v1341_v15  ;;  %v1775_v25 = vsel %vm1060_vm1, %v1629_v33, 0 }
 0x418   : > { %3290 = vmatpush3.bf16.xpose.msra.mxu0 %v1681_v32  ;;  %3291 = vmatprep.mubr.msk.bf16.mxu0 %vm4031_vm0, %v4030_v27 }
 0x419   : > { %3301 = vmatprep.subr.bf16.mxu0 %v4030_v27 }
 0x41b   : > { %3286 = vmatmul.mubr.msk.bf16.vlgmr.msra.gmra.mxu1 %vm1060_vm1, %v1622_v22 }
 0x41c   : > { %3296 = vmatpush3.bf16.xpose.msra.mxu1 %v1728_v41  ;;  %3297 = vmatprep.mubr.msk.bf16.mxu1 %vm4031_vm0, %v4030_v27 }
 0x41d   : > { %3307 = vmatprep.subr.bf16.mxu1 %v4030_v27 }
 0x41f   : > { %3292 = vmatmul.mubr.msk.bf16.vlgmr.msra.gmra.mxu0 %vm1060_vm1, %v1623_v44 }
 0x420   : > { %3302 = vmatpush3.bf16.xpose.msra.mxu0 %v1775_v25  ;;  %3303 = vmatprep.mubr.msk.bf16.mxu0 %vm4031_vm0, %v4030_v27 }
 0x421   : > { %3313 = vmatprep.subr.bf16.mxu0 %v4030_v27 }
 0x423   : > { %3298 = vmatmul.mubr.msk.bf16.vlgmr.msra.gmra.mxu1 %vm1060_vm1, %v1624_v54 }
 0x424   : > { %3308 = vmatpush3.bf16.msra.mxu1 %v1910_v40  ;;  %3309 = vmatprep.mubr.msk.bf16.mxu1 %vm4031_vm0, %v4030_v27 }
 0x425   : > { %3319 = vmatprep.subr.bf16.mxu1 %v4030_v27 }
 0x427   : > { %3304 = vmatmul.mubr.msk.bf16.vlgmr.msra.gmra.mxu0 %vm1060_vm1, %v1625_v56 }
 0x428   : > { %3315 = vmatprep.mubr.msk.bf16.mxu0 %vm4031_vm0, %v4030_v27 }
 0x476   : > { %v4573_v42 = vpop.f32.mrf.mxu1 }
 0x478   : > { %v3263_v46 = vpop.f32.mrf.mxu1 }
 0x47a   : > { %v4575_v57 = vpop.f32.mrf.mxu1 }
 0x47c   : > { %v3264_v58 = vpop.f32.mrf.mxu1 }
 0x4cf   : > { %v4577_v59 = vpop.f32.mrf.mxu0 }
 0x4d1   : > { %v3269_v36 = vpop.f32.mrf.mxu0 }
 0x4d3   : > { %v4579_v45 = vpop.f32.mrf.mxu0  ;;  %v4583_v60 = vpop.f32.mrf.mxu1 }
 0x4d4   : > { %v3534_v40 = vpack.i.bf16 %v4579_v45, %v4577_v59 }
 0x4d5   : > { %v3270_v61 = vpop.f32.mrf.mxu0  ;;  %v3275_v63 = vpop.f32.mrf.mxu1 }
 0x4d7   : > { %v4585_v0 = vpop.f32.mrf.mxu0  ;;  %v4587_v1 = vpop.f32.mrf.mxu1 }
 0x4d8   : > { %v3539_v2 = vpack.i.bf16 %v4587_v1, %v4583_v60 }
 0x4d9   : > { %v3281_v5 = vpop.f32.mrf.mxu0  ;;  %v3276_v62 = vpop.f32.mrf.mxu1 }
 0x4db   : > { %v4591_v7 = vpop.f32.mrf.mxu0  ;;  %v1670_v9 = vpop.f32.mrf.mxu1 }
 0x4dc   : > { %v3544_v8 = vpack.i.bf16 %v4591_v7, %v4585_v0  ;;  %v1671_v3 = vadd.f32 %v1670_v9, %v4441_v51 }
 0x4dd   : > { %v3282_v10 = vpop.f32.mrf.mxu0  ;;  %v3287_v4 = vpop.f32.mrf.mxu1 }
 0x4de   : > { %v1818_v12 = vsel %vm1249_vm2, %v1671_v3, -inf }
 0x4df   : > { %v1717_v13 = vpop.f32.mrf.mxu0  ;;  %1819 = vmax.xlane.f32.xlu1 %v1818_v12  ;;  %v1673_v14 = vpop.f32.mrf.mxu1 }
 0x4e0   : > { %v1674_v17 = vadd.f32 %v1673_v14, %v4444_v55  ;;  %v1718_v23 = vadd.f32 %v1717_v13, %v4441_v51 }
 0x4e1   : > { %v3293_v18 = vpop.f32.mrf.mxu0  ;;  %v3288_v20 = vpop.f32.mrf.mxu1 }
 0x4e2   : > { %v1821_v43 = vsel %vm1249_vm2, %v1674_v17, -inf  ;;  %v1824_v30 = vsel %vm1249_vm2, %v1718_v23, -inf }
 0x4e3   : > { %v1720_v11 = vpop.f32.mrf.mxu0  ;;  %1822 = vmax.xlane.f32.xlu0 %v1821_v43  ;;  %v1764_v26 = vpop.f32.mrf.mxu1 }
 0x4e4   : > { %v1721_v15 = vadd.f32 %v1720_v11, %v4444_v55  ;;  %v1765_v32 = vadd.f32 %v1764_v26, %v4441_v51 }
 0x4e5   : > { %v3294_v16 = vpop.f32.mrf.mxu0  ;;  %v3299_v19 = vpop.f32.mrf.mxu1 }
 0x4e6   : > { %v1827_v28 = vsel %vm1249_vm2, %v1721_v15, -inf  ;;  %v1830_v41 = vsel %vm1249_vm2, %v1765_v32, -inf }
 0x4e7   : > { %1828 = vmax.xlane.f32.xlu1 %v1827_v28  ;;  %v1811_v31 = vpop.f32.mrf.mxu0  ;;  %v1767_v34 = vpop.f32.mrf.mxu1  ;;  %1825 = vmax.xlane.f32.xlu0 %v1824_v30 }
 0x4e8   : > { %v1768_v35 = vadd.f32 %v1767_v34, %v4444_v55  ;;  %v1812_v33 = vadd.f32 %v1811_v31, %v4441_v51 }
 0x4e9   : > { %v3305_v22 = vpop.f32.mrf.mxu0  ;;  %v3300_v21 = vpop.f32.mrf.mxu1 }
 0x4ea   : > { %v1833_v44 = vsel %vm1249_vm2, %v1768_v35, -inf  ;;  %v1836_v25 = vsel %vm1249_vm2, %v1812_v33, -inf }
 0x4eb   : > { %v1814_v24 = vpop.f32.mrf.mxu0  ;;  %1831 = vmax.xlane.f32.xlu0 %v1830_v41  ;;  %1834 = vmax.xlane.f32.xlu1 %v1833_v44 }
 0x4ec   : > { %v1815_v47 = vadd.f32 %v1814_v24, %v4444_v55 }
 0x4ed   : > { %v3306_v48 = vpop.f32.mrf.mxu0 }
 0x4ee   : > { %v1839_v49 = vsel %vm1249_vm2, %v1815_v47, -inf }
 0x4ef   : > { %1837 = vmax.xlane.f32.xlu0 %v1836_v25  ;;  %1840 = vmax.xlane.f32.xlu1 %v1839_v49 }
 0x568   : > { %v1820_v52 = vpop.xlane.xlu1 %1819 }
 0x569   : > { %v1842_v53 = vsub.f32 %v1671_v3, %v1820_v52 }
 0x56b   : > { %v1850_v54 = vmul.f32 1.442695, %v1842_v53 }
 0x56c   : > { %v1823_v51 = vpop.xlane.xlu0 %1822 }
 0x56d   : > { %3676 = vpow2.f32 %v1850_v54  ;;  %v1843_v56 = vsub.f32 %v1674_v17, %v1823_v51 }
 0x56f   : > { %v1852_v46 = vmul.f32 1.442695, %v1843_v56 }
 0x570   : > { %v1829_v58 = vpop.xlane.xlu1 %1828  ;;  %v1826_v36 = vpop.xlane.xlu0 %1825 }
 0x571   : > { %v1845_v61 = vsub.f32 %v1721_v15, %v1829_v58  ;;  %3678 = vpow2.f32 %v1852_v46  ;;  %v1844_v63 = vsub.f32 %v1718_v23, %v1826_v36 }
 0x573   : > { %v1856_v55 = vmul.f32 1.442695, %v1845_v61  ;;  %v1854_v5 = vmul.f32 1.442695, %v1844_v63 }
 0x574   : > { %v1832_v62 = vpop.xlane.xlu0 %1831  ;;  %v1835_v9 = vpop.xlane.xlu1 %1834 }
 0x575   : > { %3680 = vpow2.f32 %v1856_v55  ;;  %v1846_v10 = vsub.f32 %v1765_v32, %v1832_v62  ;;  %v1847_v4 = vsub.f32 %v1768_v35, %v1835_v9 }
 0x576   : > { %3682 = vpow2.f32 %v1854_v5 }
 0x577   : > { %v1858_v12 = vmul.f32 1.442695, %v1846_v10  ;;  %v1860_v3 = vmul.f32 1.442695, %v1847_v4 }
 0x578   : > { %v1838_v13 = vpop.xlane.xlu0 %1837  ;;  %v1841_v35 = vpop.xlane.xlu1 %1840 }
 0x579   : > { %3684 = vpow2.f32 %v1858_v12  ;;  %v1848_v14 = vsub.f32 %v1812_v33, %v1838_v13  ;;  %v1849_v22 = vsub.f32 %v1815_v47, %v1841_v35 }
 0x57a   : > { %v3677_v17 = vpop.eup %3676  ;;  %3686 = vpow2.f32 %v1860_v3 }
 0x57b   : > { %v1862_v18 = vmul.f32 1.442695, %v1848_v14  ;;  %v1866_v20 = vsel %vm1249_vm2, %v3677_v17, 0.0  ;;  %v1864_v21 = vmul.f32 1.442695, %v1849_v22 }
 0x57c   : > { %1867 = vadd.xlane.f32.xlu0 %v1866_v20 }
 0x57d   : > { %3688 = vpow2.f32 %v1862_v18 }
 0x57e   : > { %v3679_v23 = vpop.eup %3678  ;;  %3690 = vpow2.f32 %v1864_v21 }
 0x57f   : > { %v1869_v43 = vsel %vm1249_vm2, %v3679_v23, 0.0 }
 0x580   : > { %1870 = vadd.xlane.f32.xlu1 %v1869_v43 }
 0x582   : > { %v3681_v11 = vpop.eup %3680 }
 0x583   : > { %v3683_v15 = vpop.eup %3682  ;;  %v1875_v26 = vsel %vm1249_vm2, %v3681_v11, 0.0 }
 0x584   : > { %v1872_v16 = vsel %vm1249_vm2, %v3683_v15, 0.0  ;;  %1876 = vadd.xlane.f32.xlu1 %v1875_v26 }
 0x585   : > { %1873 = vadd.xlane.f32.xlu0 %v1872_v16 }
 0x586   : > { %v3685_v19 = vpop.eup %3684 }
 0x587   : > { %v3687_v28 = vpop.eup %3686  ;;  %v1878_v32 = vsel %vm1249_vm2, %v3685_v19, 0.0 }
 0x588   : > { %v1881_v30 = vsel %vm1249_vm2, %v3687_v28, 0.0 }
 0x589   : > { %1879 = vadd.xlane.f32.xlu0 %v1878_v32  ;;  %1882 = vadd.xlane.f32.xlu1 %v1881_v30 }
 0x58a   : > { %v4617_v31 = vpop.eup %3688 }
 0x58b   : > { %v1884_v34 = vsel %vm1249_vm2, %v4617_v31, 0.0  ;;  %v4629_v33 = vpop.eup %3690 }
 0x58c   : > { %v1887_v41 = vsel %vm1249_vm2, %v4629_v33, 0.0 }
 0x58d   : > { %1885 = vadd.xlane.f32.xlu0 %v1884_v34 }
 0x59a   : > { %3525 = vrot.lane.b32.xlu1 %v4438_v50, %s4033_s23 }
 0x5a3   : > { %3520 = vrot.lane.b32.xlu0 %v4438_v50, %s4032_s16 }
 0x5a7   : > { %3535 = vrot.lane.b32.xlu0 %v3534_v40, %s4034_s2 }
 0x5be   : > { %1888 = vadd.xlane.f32.xlu1 %v1887_v41 }
 0x5cf   : > { %3530 = vrot.lane.b32.xlu1 %v4438_v50, %s4034_s2 }
 0x5d3   : > { %3540 = vrot.lane.b32.xlu1 %v3539_v2, %s4033_s23 }
 0x5d7   : > { %3545 = vrot.lane.b32.xlu1 %v3544_v8, %s4032_s16 }
 0x605   : > { %v1868_v59 = vpop.xlane.xlu0 %1867 }
 0x606   : > { %3692 = vrcp.f32 %v1868_v59 }
 0x609   : > { %v1871_v45 = vpop.xlane.xlu1 %1870 }
 0x60a   : > { %3694 = vrcp.f32 %v1871_v45 }
 0x60d   : > { %v1877_v44 = vpop.xlane.xlu1 %1876 }
 0x60e   : > { %v1874_v40 = vpop.xlane.xlu0 %1873 }
 0x60f   : > { %3696 = vrcp.f32 %v1874_v40 }
 0x610   : > { %3698 = vrcp.f32 %v1877_v44  ;;  %v3596_v44 = vld [vmem:[%s4319_s17 + $0x38] sm:$0xff]  }
 0x612   : > { %v1880_v24 = vpop.xlane.xlu0 %1879  ;;  %v1883_v50 = vpop.xlane.xlu1 %1882 }
 0x613   : > { %3700 = vrcp.f32 %v1880_v24  ;;  %v3693_v47 = vpop.eup %3692  ;;  %v3597_v24 = vld [vmem:[%s4319_s17 + $0x30] sm:$0xff]  }
 0x614   : > { %3702 = vrcp.f32 %v1883_v50  ;;  %v1891_v0 = vmul.f32 %v3693_v47, %v3677_v17 }
 0x616   : > { %v1886_v60 = vpop.xlane.xlu0 %1885  ;;  %v3526_v1 = vpop.permute.xlu1 %3525 }
 0x617   : > { %v3695_v2 = vpop.eup %3694  ;;  %v3528_v48 = vunpack.i.h.bf16 %v3526_v1  ;;  %v3527_v49 = vunpack.i.l.bf16 %v3526_v1  ;;  %3704 = vrcp.f32 %v1886_v60  ;;  %v3598_v60 = vld [vmem:[%s4319_s17 + $0x28] sm:$0xff]  }
 0x618   : > { %v1893_v7 = vmul.f32 %v3695_v2, %v3679_v23 }
 0x619   : > { %v1912_v51 = vpack.c.bf16 %v3528_v48, %v3527_v49 }
 0x61a   : > { %v3521_v8 = vpop.permute.xlu0 %3520  ;;  %v1906_v53 = vpack.c.bf16 %v1893_v7, %v1891_v0  ;;  %v3599_v0 = vld [vmem:[%s4319_s17 + $0x20] sm:$0xff]  }
 0x61b   : > { %v3523_v25 = vunpack.i.h.bf16 %v3521_v8  ;;  %v3522_v52 = vunpack.i.l.bf16 %v3521_v8 }
 0x61c   : > { %v3697_v54 = vpop.eup %3696  ;;  %3310 = vmatmul.mubr.msk.bf16.vlgmr.msra.gmra.mxu1 %vm1249_vm2, %v1906_v53  ;;  %v3602_v53 = vld [vmem:[%s4319_s17 + $0x8] sm:$0xff]  }
 0x61d   : > { %v3699_v56 = vpop.eup %3698  ;;  %v1911_v46 = vpack.c.bf16 %v3523_v25, %v3522_v52  ;;  %v1895_v58 = vmul.f32 %v3697_v54, %v3683_v15  ;;  %3320 = vmatpush3.bf16.msra.mxu1 %v1912_v51  ;;  %3321 = vmatprep.mubr.msk.bf16.mxu1 %vm4031_vm0, %v4030_v27  ;;  %v3600_v25 = vld [vmem:[%s4319_s17 + $0x18] sm:$0xff]   ;;  %v3601_v52 = vld [vmem:[%s4319_s17 + $0x10] sm:$0xff]   ;;  %v3603_v54 = vld [vmem:[%s4319_s17] sm:$0xff]  }
 0x61e   : > { %v1897_v36 = vmul.f32 %v3699_v56, %v3681_v11  ;;  %v3536_v13 = vpop.permute.xlu0 %3535  ;;  %3331 = vmatprep.subr.bf16.mxu1 %v3596_v44 }
 0x61f   : > { %3314 = vmatpush3.bf16.msra.mxu0 %v1911_v46  ;;  %v3538_v18 = vunpack.i.h.bf16 %v3536_v13  ;;  %v3537_v20 = vunpack.i.l.bf16 %v3536_v13 }
 0x620   : > { %v3701_v61 = vpop.eup %3700  ;;  %v1907_v63 = vpack.c.bf16 %v1897_v36, %v1895_v58  ;;  %3325 = vmatprep.subr.bf16.mxu0 %v4030_v27 }
 0x621   : > { %v3703_v55 = vpop.eup %3702  ;;  %v1899_v5 = vmul.f32 %v3701_v61, %v3685_v19  ;;  %v1547_v15 = vsel %vm1060_vm1, %v4575_v57, %v3538_v18  ;;  %v1546_v26 = vsel %vm1060_vm1, %v4573_v42, %v3537_v20 }
 0x622   : > { %3316 = vmatmul.mubr.msk.bf16.vlgmr.msra.gmra.mxu0 %vm1249_vm2, %v1907_v63  ;;  %v1901_v62 = vmul.f32 %v3703_v55, %v3687_v28 }
 0x623   : > { %3327 = vmatprep.mubr.msk.bf16.mxu0 %vm4031_vm0, %v4030_v27 }
 0x624   : > { %v1908_v9 = vpack.c.bf16 %v1901_v62, %v1899_v5  ;;  %v3705_v11 = vpop.eup %3704 }
 0x625   : > { %v1903_v22 = vmul.f32 %v3705_v11, %v4617_v31  ;;  %v3085_v11 = vld [vmem:[%s4867_s19] ss:$0 sm:$0xff] }
 0x626   : > { %3322 = vmatmul.mubr.msk.bf16.vlgmr.msra.gmra.mxu1 %vm1249_vm2, %v1908_v9 }
 0x627   : > { %3332 = vmatpush3.bf16.msra.mxu1 %v3596_v44 }
 0x628   : > { %3333 = vmatprep.subr.bf16.mxu1 %v3597_v24 }
 0x62b   : > { %3334 = vmatpush3.bf16.msra.mxu1 %v3597_v24 }
 0x62c   : > { %3335 = vmatprep.subr.bf16.mxu1 %v3598_v60 }
 0x62f   : > { %3336 = vmatpush3.bf16.msra.mxu1 %v3598_v60 }
 0x630   : > { %3337 = vmatprep.subr.bf16.mxu1 %v3599_v0 }
 0x633   : > { %3338 = vmatpush3.bf16.msra.mxu1 %v3599_v0 }
 0x634   : > { %3339 = vmatprep.subr.bf16.mxu1 %v3600_v25 }
 0x637   : > { %3340 = vmatpush3.bf16.msra.mxu1 %v3600_v25 }
 0x638   : > { %3341 = vmatprep.subr.bf16.mxu1 %v3601_v52 }
 0x63b   : > { %3342 = vmatpush3.bf16.msra.mxu1 %v3601_v52  ;;  %v3609_v52 = vld [vmem:[%s4321_s24 + $0x64] ss:$8 sps:$4 sm:$0xff]  }
 0x63c   : > { %3343 = vmatprep.subr.bf16.mxu1 %v3602_v53 }
 0x63f   : > { %3344 = vmatpush3.bf16.msra.mxu1 %v3602_v53  ;;  %v3607_v53 = vld [vmem:[%s4321_s24 + $0x60] ss:$8 sps:$4 sm:$0xff]  }
 0x640   : > { %3345 = vmatprep.subr.bf16.mxu1 %v3603_v54 }
 0x643   : > { %3346 = vmatpush3.bf16.msra.mxu1 %v3603_v54  ;;  %v3612_v54 = vld [vmem:[%s4321_s24 + $0x54] ss:$8 sps:$4 sm:$0xff]  }
 0x647   : > { %v1889_v10 = vpop.xlane.xlu1 %1888 }
 0x648   : > { %3706 = vrcp.f32 %v1889_v10 }
 0x64b   : > { %v3531_v4 = vpop.permute.xlu1 %3530 }
 0x64c   : > { %v3533_v12 = vunpack.i.h.bf16 %v3531_v4  ;;  %v3532_v3 = vunpack.i.l.bf16 %v3531_v4 }
 0x64e   : > { %v1913_v14 = vpack.c.bf16 %v3533_v12, %v3532_v3 }
 0x64f   : > { %v3541_v17 = vpop.permute.xlu1 %3540 }
 0x650   : > { %3326 = vmatpush3.bf16.msra.mxu0 %v1913_v14  ;;  %v3543_v23 = vunpack.i.h.bf16 %v3541_v17  ;;  %v3542_v43 = vunpack.i.l.bf16 %v3541_v17 }
 0x652   : > { %v1550_v32 = vsel %vm1548_vm3, %v1547_v15, %v3543_v23  ;;  %v1549_v30 = vsel %vm1548_vm3, %v1546_v26, %v3542_v43 }
 0x653   : > { %v3546_v27 = vpop.permute.xlu1 %3545 }
 0x654   : > { %v3548_v16 = vunpack.i.h.bf16 %v3546_v27  ;;  %v3547_v19 = vunpack.i.l.bf16 %v3546_v27 }
 0x655   : > { %v3707_v28 = vpop.eup %3706 }
 0x656   : > { %v1552_v34 = vsel %vm1551_vm4, %v1549_v30, %v3547_v19  ;;  %v1553_v35 = vsel %vm1551_vm4, %v1550_v32, %v3548_v16  ;;  %v1905_v57 = vmul.f32 %v3707_v28, %v4629_v33  ;;  %v3724_v19 = vld [vmem:[#allocation2 + $0x10] sm:$0xff] }
 0x657   : > { %v2120_v21 = vpack.c.bf16 %v1553_v35, %v1552_v34  ;;  %v3725_v35 = vld [vmem:[#allocation2] sm:$0xff] }
 0x658   : > { %v1909_v41 = vpack.c.bf16 %v1905_v57, %v1903_v22  ;;  %v3726_v57 = vld [vmem:[#allocation2 + $0x18] sm:$0xff] }
 0x659   : > { %3347 = vmatprep.mubr.bf16.mxu1 %v2120_v21 }
 0x65a   : > { %3328 = vmatmul.mubr.msk.bf16.vlgmr.msra.gmra.mxu0 %vm1249_vm2, %v1909_v41  ;;  %v3727_v41 = vld [vmem:[#allocation2 + $0x8] sm:$0xff] }
 0x65b   : > { %2449 = vmatprep.mubr.bf16.mxu0 %v4029_v6 }
 0x6dc   : > { %v1951_v42 = vpop.f32.mrf.mxu1 }
 0x6de   : > { %v3311_v59 = vpop.f32.mrf.mxu1 }
 0x6df   : > { %v3604_v59 = vld [vmem:[%s4321_s24 + $0x70] ss:$8 sps:$4 sm:$0xff]  }
 0x6e0   : > { %v1954_v45 = vpop.f32.mrf.mxu1 }
 0x6e2   : > { %v1995_v40 = vpop.f32.mrf.mxu0  ;;  %v3312_v50 = vpop.f32.mrf.mxu1 }
 0x6e4   : > { %v3317_v47 = vpop.f32.mrf.mxu0 }
 0x6e6   : > { %v2039_v31 = vpop.f32.mrf.mxu1  ;;  %v1998_v33 = vpop.f32.mrf.mxu0 }
 0x6e7   : > { %v3549_v1 = vpack.i.bf16 %v1998_v33, %v1995_v40 }
 0x6e8   : > { %v3323_v2 = vpop.f32.mrf.mxu1  ;;  %v3318_v48 = vpop.f32.mrf.mxu0 }
 0x6e9   : > { %3550 = vrot.lane.b32.xlu0 %v3549_v1, %s4034_s2 }
 0x6ea   : > { %v2042_v49 = vpop.f32.mrf.mxu1 }
 0x6eb   : > { %v3554_v7 = vpack.i.bf16 %v2042_v49, %v2039_v31 }
 0x6ec   : > { %v3324_v8 = vpop.f32.mrf.mxu1 }
 0x6ed   : > { %3555 = vrot.lane.b32.xlu0 %v3554_v7, %s4033_s23 }
 0x71a   : > { %v2083_v51 = vpop.f32.mrf.mxu0 }
 0x71c   : > { %v3329_v56 = vpop.f32.mrf.mxu0 }
 0x71d   : > { %v3615_v56 = vld [vmem:[%s4321_s24 + $0x44] ss:$8 sps:$4 sm:$0xff]  }
 0x71e   : > { %v2086_v46 = vpop.f32.mrf.mxu0 }
 0x71f   : > { %v3559_v58 = vpack.i.bf16 %v2086_v46, %v2083_v51  ;;  %v3610_v51 = vld [vmem:[%s4321_s24 + $0x50] ss:$8 sps:$4 sm:$0xff]   ;;  %v3613_v46 = vld [vmem:[%s4321_s24 + $0x40] ss:$8 sps:$4 sm:$0xff]  }
 0x720   : > { %v3330_v36 = vpop.f32.mrf.mxu0 }
 0x721   : > { %3560 = vrot.lane.b32.xlu1 %v3559_v58, %s4032_s16  ;;  %v3616_v58 = vld [vmem:[%s4321_s24 + $0x30] ss:$8 sps:$4 sm:$0xff]   ;;  %v3618_v36 = vld [vmem:[%s4321_s24 + $0x34] ss:$8 sps:$4 sm:$0xff]  }
 0x75b   : > { %v3551_v61 = vpop.permute.xlu0 %3550 }
 0x75c   : > { %v3553_v55 = vunpack.i.h.bf16 %v3551_v61  ;;  %v3552_v5 = vunpack.i.l.bf16 %v3551_v61  ;;  %v3621_v61 = vld [vmem:[%s4321_s24 + $0x24] ss:$8 sps:$4 sm:$0xff]  }
 0x75e   : > { %v2115_v4 = vsel %vm1060_vm1, %v1954_v45, %v3553_v55  ;;  %v2114_v12 = vsel %vm1060_vm1, %v1951_v42, %v3552_v5  ;;  %v3606_v45 = vld [vmem:[%s4321_s24 + $0x74] ss:$8 sps:$4 sm:$0xff]   ;;  %v3622_v5 = vld [vmem:[%s4321_s24 + $0x10] ss:$8 sps:$4 sm:$0xff]  }
 0x75f   : > { %v3556_v63 = vpop.permute.xlu0 %3555  ;;  %2417 = vmatprep.subr.bf16.mxu0 %v3606_v45  ;;  %v3624_v55 = vld [vmem:[%s4321_s24 + $0x14] ss:$8 sps:$4 sm:$0xff]  }
 0x760   : > { %v3558_v62 = vunpack.i.h.bf16 %v3556_v63  ;;  %v3557_v9 = vunpack.i.l.bf16 %v3556_v63  ;;  %2418 = vmatpush1.bf16.msra.mxu0 %v3604_v59  ;;  %v3619_v63 = vld [vmem:[%s4321_s24 + $0x20] ss:$8 sps:$4 sm:$0xff]  }
 0x761   : > { %2419 = vmatprep.subr.bf16.mxu0 %v3609_v52  ;;  %v3640_v52 = vld [vmem:[%s4323_s14 + $0x48] sm:$0xff]  }
 0x762   : > { %v2116_v14 = vsel %vm1548_vm3, %v2114_v12, %v3557_v9  ;;  %v2117_v17 = vsel %vm1548_vm3, %v2115_v4, %v3558_v62  ;;  %v3627_v62 = vld [vmem:[%s4321_s24 + $0x4] ss:$8 sps:$4 sm:$0xff]   ;;  %v3625_v9 = vld [vmem:[%s4321_s24] ss:$8 sps:$4 sm:$0xff]   ;;  %v3629_v4 = vld [vmem:[%s4323_s14 + $0x38] sm:$0xff]  }
 0x763   : > { %v3630_v12 = vld [vmem:[%s4323_s14 + $0x70] sm:$0xff]  }
 0x764   : > { %2420 = vmatpush1.bf16.msra.mxu0 %v3607_v53  ;;  %v3641_v53 = vld [vmem:[%s4323_s14 + $0x8] sm:$0xff]  }
 0x765   : > { %2421 = vmatprep.subr.bf16.mxu0 %v3612_v54  ;;  %v3642_v54 = vld [vmem:[%s4323_s14 + $0x40] sm:$0xff]  }
 0x768   : > { %2422 = vmatpush1.bf16.msra.mxu0 %v3610_v51  ;;  %v3643_v51 = vld [vmem:[%s4323_s14] sm:$0xff]  }
 0x769   : > { %2423 = vmatprep.subr.bf16.mxu0 %v3615_v56 }
 0x76c   : > { %2424 = vmatpush1.bf16.msra.mxu0 %v3613_v46 }
 0x76d   : > { %2425 = vmatprep.subr.bf16.mxu0 %v3618_v36 }
 0x770   : > { %2426 = vmatpush1.bf16.msra.mxu0 %v3616_v58 }
 0x771   : > { %2427 = vmatprep.subr.bf16.mxu0 %v3621_v61 }
 0x774   : > { %2428 = vmatpush1.bf16.msra.mxu0 %v3619_v63 }
 0x775   : > { %2429 = vmatprep.subr.bf16.mxu0 %v3624_v55 }
 0x778   : > { %2430 = vmatpush1.bf16.msra.mxu0 %v3622_v5 }
 0x779   : > { %2431 = vmatprep.subr.bf16.mxu0 %v3627_v62 }
 0x77c   : > { %2432 = vmatpush1.bf16.msra.mxu0 %v3625_v9 }
 0x793   : > { %v3561_v10 = vpop.permute.xlu1 %3560 }
 0x794   : > { %v3563_v3 = vunpack.i.h.bf16 %v3561_v10  ;;  %v3562_v13 = vunpack.i.l.bf16 %v3561_v10  ;;  %v3628_v10 = vld [vmem:[%s4323_s14 + $0x78] sm:$0xff]  }
 0x795   : > { %3187 = vmatprep.subr.bf16.mxu1 %v3628_v10 }
 0x796   : > { %v2119_v18 = vsel %vm1551_vm4, %v2117_v17, %v3563_v3  ;;  %v2118_v20 = vsel %vm1551_vm4, %v2116_v14, %v3562_v13  ;;  %v3631_v3 = vld [vmem:[%s4323_s14 + $0x30] sm:$0xff]   ;;  %v3632_v13 = vld [vmem:[%s4323_s14 + $0x68] sm:$0xff]   ;;  %v3634_v17 = vld [vmem:[%s4323_s14 + $0x60] sm:$0xff]  }
 0x797   : > { %v2121_v23 = vpack.c.bf16 %v2119_v18, %v2118_v20  ;;  %v3633_v14 = vld [vmem:[%s4323_s14 + $0x28] sm:$0xff]   ;;  %v3635_v18 = vld [vmem:[%s4323_s14 + $0x20] sm:$0xff]   ;;  %v3636_v20 = vld [vmem:[%s4323_s14 + $0x58] sm:$0xff]  }
 0x799   : > { %3348 = vmatmul.mubr.bf16.vlgmr.msra.gmra.mxu1 %v2121_v23  ;;  %v3637_v23 = vld [vmem:[%s4323_s14 + $0x18] sm:$0xff]  }
 0x79a   : > { %3188 = vmatpush3.bf16.msra.mxu1 %v3629_v4 }
 0x79b   : > { %3189 = vmatprep.subr.bf16.mxu1 %v3630_v12 }
 0x79e   : > { %3190 = vmatpush3.bf16.msra.mxu1 %v3631_v3 }
 0x79f   : > { %3191 = vmatprep.subr.bf16.mxu1 %v3632_v13 }
 0x7a2   : > { %3192 = vmatpush3.bf16.msra.mxu1 %v3633_v14 }
 0x7a3   : > { %3193 = vmatprep.subr.bf16.mxu1 %v3634_v17 }
 0x7a6   : > { %3194 = vmatpush3.bf16.msra.mxu1 %v3635_v18 }
 0x7a7   : > { %3195 = vmatprep.subr.bf16.mxu1 %v3636_v20 }
 0x7aa   : > { %3196 = vmatpush3.bf16.msra.mxu1 %v3637_v23 }
 0x859   : > { %v3349_v43 = vpop.f32.mrf.mxu1 }
 0x85a   : > { %v2236_v16 = vadd.f32 %v3349_v43, %v3085_v11 }
 0x85b   : > { %v2227_v27 = vpop.f32.mrf.mxu1 }
 0x85c   : > { %v2228_v15 = vadd.f32 %v3085_v11, %v2227_v27  ;;  %v2244_v21 = vadd.f32 %v3726_v57, %v2236_v16 }
 0x85d   : > { %v3350_v26 = vpop.f32.mrf.mxu1 }
 0x85e   : > { %v2242_v28 = vadd.f32 %v3724_v19, %v2228_v15  ;;  %v2239_v34 = vadd.f32 %v3350_v26, %v3085_v11 }
 0x85f   : > { %v2230_v32 = vpop.f32.mrf.mxu1 }
 0x860   : > { %v2231_v30 = vadd.f32 %v3085_v11, %v2230_v32  ;;  %2246 = vadd.xlane.f32.xlu0 %v2242_v28  ;;  %v2245_v42 = vadd.f32 %v3727_v41, %v2239_v34 }
 0x862   : > { %v2243_v22 = vadd.f32 %v3725_v35, %v2231_v30 }
 0x864   : > { %2248 = vadd.xlane.f32.xlu1 %v2243_v22  ;;  %2250 = vadd.xlane.f32.xlu0 %v2244_v21 }
 0x868   : > { %2252 = vadd.xlane.f32.xlu0 %v2245_v42 }
 0x8e9   : > { %v2247_v40 = vpop.xlane.xlu0 %2246 }
 0x8ea   : > { %v2255_v44 = vmul.f32 0.0078125, %v2247_v40 }
 0x8ec   : > { %v4687_v24 = vsub.f32 %v2242_v28, %v2255_v44 }
 0x8ed   : > { %v2249_v50 = vpop.xlane.xlu1 %2248  ;;  %v2251_v47 = vpop.xlane.xlu0 %2250 }
 0x8ee   : > { %v2256_v31 = vmul.f32 0.0078125, %v2249_v50  ;;  %v2257_v33 = vmul.f32 0.0078125, %v2251_v47  ;;  %v2263_v60 = vmul.f32 %v4687_v24, %v4687_v24 }
 0x8f0   : > { %v4691_v1 = vsub.f32 %v2243_v22, %v2256_v31  ;;  %v4693_v2 = vsub.f32 %v2244_v21, %v2257_v33  ;;  %2267 = vadd.xlane.f32.xlu1 %v2263_v60  ;;  %v4728_v22 = vld [vmem:[%s4315_s1] sm:$0xf] }
 0x8f1   : > { %v2253_v48 = vpop.xlane.xlu0 %2252  ;;  %v2294_v41 = vrot.slane %v4728_v22, %v4359_v38  ;;  %v2302_v40 = vrot.slane %v4728_v22, %v4362_v39 }
 0x8f2   : > { %v2258_v49 = vmul.f32 0.0078125, %v2253_v48  ;;  %v2264_v0 = vmul.f32 %v4691_v1, %v4691_v1  ;;  %v2265_v7 = vmul.f32 %v4693_v2, %v4693_v2 }
 0x8f4   : > { %v4699_v8 = vsub.f32 %v2245_v42, %v2258_v49  ;;  %2269 = vadd.xlane.f32.xlu0 %v2264_v0  ;;  %2271 = vadd.xlane.f32.xlu1 %v2265_v7 }
 0x8f6   : > { %v2266_v25 = vmul.f32 %v4699_v8, %v4699_v8 }
 0x8f8   : > { %2273 = vadd.xlane.f32.xlu0 %v2266_v25  ;;  %v3639_v25 = vld [vmem:[%s4323_s14 + $0x10] sm:$0xff]  }
 0x979   : > { %v2268_v43 = vpop.xlane.xlu1 %2267 }
 0x97a   : > { %v2275_v11 = vmul.f32 0.0078125, %v2268_v43 }
 0x97c   : > { %v2279_v27 = vadd.f32 1e-05, %v2275_v11 }
 0x97d   : > { %v2272_v15 = vpop.xlane.xlu1 %2271  ;;  %v2270_v26 = vpop.xlane.xlu0 %2269 }
 0x97e   : > { %3708 = vrsqrt.f32 %v2279_v27  ;;  %v2277_v16 = vmul.f32 0.0078125, %v2272_v15  ;;  %v2276_v19 = vmul.f32 0.0078125, %v2270_v26 }
 0x980   : > { %v2280_v28 = vadd.f32 1e-05, %v2276_v19  ;;  %v2281_v32 = vadd.f32 1e-05, %v2277_v16 }
 0x981   : > { %v2274_v30 = vpop.xlane.xlu0 %2273 }
 0x982   : > { %v2278_v34 = vmul.f32 0.0078125, %v2274_v30  ;;  %3710 = vrsqrt.f32 %v2280_v28 }
 0x983   : > { %3712 = vrsqrt.f32 %v2281_v32 }
 0x984   : > { %v2282_v35 = vadd.f32 1e-05, %v2278_v34 }
 0x986   : > { %3714 = vrsqrt.f32 %v2282_v35  ;;  %v3110_v35 = vld [vmem:[%s677_s10] ss:$0 sm:$0xff] }
 0x98b   : > { %v3709_v57 = vpop.eup %3708 }
 0x98c   : > { %v2287_v21 = vmul.f32 %v3709_v57, %v4687_v24 }
 0x98e   : > { %v2295_v45 = vmul.f32 %v2294_v41, %v2287_v21 }
 0x98f   : > { %v3711_v42 = vpop.eup %3710 }
 0x990   : > { %v2288_v59 = vmul.f32 %v3711_v42, %v4691_v1  ;;  %v3713_v44 = vpop.eup %3712  ;;  %v4737_v33 = vadd.f32 %v2302_v40, %v2295_v45 }
 0x991   : > { %v2289_v60 = vmul.f32 %v3713_v44, %v4693_v2  ;;  %v3638_v2 = vld [vmem:[%s4323_s14 + $0x50] sm:$0xff]  }
 0x992   : > { %v2296_v47 = vmul.f32 %v2294_v41, %v2288_v59  ;;  %3197 = vmatprep.subr.bf16.mxu1 %v3638_v2 }
 0x993   : > { %v3715_v50 = vpop.eup %3714  ;;  %v2297_v49 = vmul.f32 %v2294_v41, %v2289_v60  ;;  %3198 = vmatpush3.bf16.msra.mxu1 %v3639_v25 }
 0x994   : > { %v2290_v31 = vmul.f32 %v3715_v50, %v4699_v8  ;;  %v4739_v24 = vadd.f32 %v2302_v40, %v2296_v47  ;;  %3199 = vmatprep.subr.bf16.mxu1 %v3640_v52 }
 0x995   : > { %v4747_v7 = vadd.f32 %v2302_v40, %v2297_v49 }
 0x996   : > { %v2307_v1 = vpack.c.bf16 %v4739_v24, %v4737_v33  ;;  %v2298_v48 = vmul.f32 %v2294_v41, %v2290_v31 }
 0x997   : > { %3200 = vmatpush3.bf16.msra.mxu1 %v3641_v53 }
 0x998   : > { %2450 = vmatmul.mubr.bf16.vlgmr.msra.gmra.mxu0 %v2307_v1  ;;  %v4745_v0 = vadd.f32 %v2302_v40, %v2298_v48  ;;  %3201 = vmatprep.subr.bf16.mxu1 %v3642_v54 }
 0x999   : > { %2459 = vmatprep.mubr.bf16.mxu0 %v4029_v6  ;;  %v2325_v6 = vld [vmem:[%s4305_s18] sm:$0x3] }
 0x99a   : > { %v2308_v8 = vpack.c.bf16 %v4745_v0, %v4747_v7  ;;  %v2334_v46 = vrot.slane %v2325_v6, %v4362_v39  ;;  %v2330_v58 = vrot.slane %v2325_v6, %v4359_v38 }
 0x99b   : > { %3202 = vmatpush3.bf16.msra.mxu1 %v3643_v51 }
 0x9a0   : > { %2460 = vmatmul.mubr.bf16.gmra.mxu0 %v2308_v8 }
 0xa58   : > { %v2451_v56 = vpop.f32.mrf.mxu0 }
 0xa59   : > { %v2452_v5 = vadd.f32 %v2451_v56, %v2330_v58 }
 0xa5a   : > { %v2453_v36 = vpop.f32.mrf.mxu0 }
 0xa5b   : > { %v2454_v63 = vadd.f32 %v2453_v36, %v2334_v46  ;;  %v2470_v13 = vmax.f32 %v2452_v5, 0.0 }
 0xa5c   : > { %v2455_v61 = vpop.f32.mrf.mxu0 }
 0xa5d   : > { %v2456_v55 = vadd.f32 %v2455_v61, %v2330_v58  ;;  %v2471_v12 = vmax.f32 %v2454_v63, 0.0 }
 0xa5e   : > { %v2457_v62 = vpop.f32.mrf.mxu0 }
 0xa5f   : > { %v2458_v9 = vadd.f32 %v2457_v62, %v2334_v46  ;;  %v2472_v10 = vmax.f32 %v2456_v55, 0.0 }
 0xa60   : > { %v2461_v4 = vpop.f32.mrf.mxu0 }
 0xa61   : > { %v2473_v3 = vmax.f32 %v2458_v9, 0.0  ;;  %v2478_v18 = vpack.c.bf16 %v2472_v10, %v2470_v13  ;;  %v2462_v11 = vadd.f32 %v2461_v4, %v2330_v58 }
 0xa62   : > { %v2463_v14 = vpop.f32.mrf.mxu0 }
 0xa63   : > { %v2479_v17 = vpack.c.bf16 %v2473_v3, %v2471_v12  ;;  %v2464_v23 = vadd.f32 %v2463_v14, %v2334_v46  ;;  %v2474_v28 = vmax.f32 %v2462_v11, 0.0  ;;  %v2717_v11 = vrot.slane %v4728_v22, %v749_v29 }
 0xa64   : > { %v2465_v20 = vpop.f32.mrf.mxu0 }
 0xa65   : > { %v2466_v43 = vadd.f32 %v2465_v20, %v2330_v58  ;;  %2649 = vmatprep.mubr.bf16.mxu1 %v2479_v17  ;;  %v2475_v16 = vmax.f32 %v2464_v23, 0.0  ;;  %v2724_v23 = vsub.s32 3, %v4355_v37 }
 0xa66   : > { %v2467_v27 = vpop.f32.mrf.mxu0  ;;  %2650 = vmatmul.mubr.bf16.vlgmr.msra.gmra.mxu1 %v2478_v18 }
 0xa67   : > { %v2468_v15 = vadd.f32 %v2467_v27, %v2334_v46  ;;  %v2476_v26 = vmax.f32 %v2466_v43, 0.0 }
 0xa69   : > { %v2477_v19 = vmax.f32 %v2468_v15, 0.0  ;;  %v2480_v30 = vpack.c.bf16 %v2476_v26, %v2474_v28  ;;  %v2725_v15 = vrot.slane %v4728_v22, %v2724_v23 }
 0xa6b   : > { %v2481_v32 = vpack.c.bf16 %v2477_v19, %v2475_v16 }
 0xa6d   : > { %2657 = vmatprep.mubr.bf16.mxu1 %v2481_v32 }
 0xa6e   : > { %2658 = vmatmul.mubr.bf16.gmra.mxu1 %v2480_v30 }
 0xb26   : > { %v3203_v34 = vpop.f32.mrf.mxu1 }
 0xb28   : > { %v3204_v57 = vpop.f32.mrf.mxu1 }
 0xb29   : > { %v3205_v21 = vadd.f32 %v3204_v57, %v3203_v34 }
 0xb2a   : > { %v3206_v41 = vpop.f32.mrf.mxu1 }
 0xb2b   : > { %v2652_v42 = vadd.f32 %v3205_v21, %v3110_v35 }
 0xb2c   : > { %v3207_v59 = vpop.f32.mrf.mxu1 }
 0xb2d   : > { %v3208_v45 = vadd.f32 %v3207_v59, %v3206_v41  ;;  %v2666_v40 = vadd.f32 %v2652_v42, %v4737_v33 }
 0xb2e   : > { %v3209_v44 = vpop.f32.mrf.mxu1 }
 0xb2f   : > { %v2655_v50 = vadd.f32 %v3208_v45, %v3110_v35  ;;  %2670 = vadd.xlane.f32.xlu1 %v2666_v40 }
 0xb30   : > { %v3210_v47 = vpop.f32.mrf.mxu1 }
 0xb31   : > { %v3211_v31 = vadd.f32 %v3210_v47, %v3209_v44  ;;  %v2667_v60 = vadd.f32 %v2655_v50, %v4739_v24 }
 0xb32   : > { %v3212_v1 = vpop.f32.mrf.mxu1 }
 0xb33   : > { %v2660_v48 = vadd.f32 %v3211_v31, %v3110_v35  ;;  %2672 = vadd.xlane.f32.xlu0 %v2667_v60 }
 0xb34   : > { %v3213_v49 = vpop.f32.mrf.mxu1 }
 0xb35   : > { %v3214_v8 = vadd.f32 %v3213_v49, %v3212_v1  ;;  %v2668_v2 = vadd.f32 %v2660_v48, %v4747_v7 }
 0xb37   : > { %v2663_v25 = vadd.f32 %v3214_v8, %v3110_v35  ;;  %2674 = vadd.xlane.f32.xlu1 %v2668_v2 }
 0xb39   : > { %v2669_v52 = vadd.f32 %v2663_v25, %v4745_v0 }
 0xb3b   : > { %2676 = vadd.xlane.f32.xlu0 %v2669_v52 }
 0xbb8   : > { %v2671_v33 = vpop.xlane.xlu1 %2670 }
 0xbb9   : > { %v2678_v53 = vmul.f32 0.0078125, %v2671_v33 }
 0xbbb   : > { %v2682_v54 = vsub.f32 %v2666_v40, %v2678_v53 }
 0xbbc   : > { %v2673_v51 = vpop.xlane.xlu0 %2672 }
 0xbbd   : > { %v2679_v6 = vmul.f32 0.0078125, %v2673_v51  ;;  %v2686_v56 = vmul.f32 %v2682_v54, %v2682_v54 }
 0xbbf   : > { %v2683_v46 = vsub.f32 %v2667_v60, %v2679_v6  ;;  %2690 = vadd.xlane.f32.xlu1 %v2686_v56 }
 0xbc0   : > { %v2675_v24 = vpop.xlane.xlu1 %2674 }
 0xbc1   : > { %v2680_v58 = vmul.f32 0.0078125, %v2675_v24  ;;  %v2687_v36 = vmul.f32 %v2683_v46, %v2683_v46 }
 0xbc3   : > { %v2684_v61 = vsub.f32 %v2668_v2, %v2680_v58  ;;  %2692 = vadd.xlane.f32.xlu0 %v2687_v36 }
 0xbc4   : > { %v2677_v63 = vpop.xlane.xlu0 %2676 }
 0xbc5   : > { %v2681_v7 = vmul.f32 0.0078125, %v2677_v63  ;;  %v2688_v55 = vmul.f32 %v2684_v61, %v2684_v61 }
 0xbc7   : > { %v2685_v5 = vsub.f32 %v2669_v52, %v2681_v7  ;;  %2694 = vadd.xlane.f32.xlu1 %v2688_v55 }
 0xbc9   : > { %v2689_v0 = vmul.f32 %v2685_v5, %v2685_v5 }
 0xbcb   : > { %2696 = vadd.xlane.f32.xlu0 %v2689_v0 }
 0xc48   : > { %v2691_v62 = vpop.xlane.xlu1 %2690 }
 0xc49   : > { %v2698_v9 = vmul.f32 0.0078125, %v2691_v62 }
 0xc4b   : > { %v2702_v10 = vadd.f32 1e-05, %v2698_v9 }
 0xc4c   : > { %v2693_v4 = vpop.xlane.xlu0 %2692 }
 0xc4d   : > { %3716 = vrsqrt.f32 %v2702_v10  ;;  %v2699_v12 = vmul.f32 0.0078125, %v2693_v4 }
 0xc4f   : > { %v2703_v3 = vadd.f32 1e-05, %v2699_v12 }
 0xc50   : > { %v2695_v13 = vpop.xlane.xlu1 %2694 }
 0xc51   : > { %3718 = vrsqrt.f32 %v2703_v3  ;;  %v2700_v14 = vmul.f32 0.0078125, %v2695_v13 }
 0xc53   : > { %v2704_v17 = vadd.f32 1e-05, %v2700_v14 }
 0xc54   : > { %v2697_v18 = vpop.xlane.xlu0 %2696 }
 0xc55   : > { %3720 = vrsqrt.f32 %v2704_v17  ;;  %v2701_v20 = vmul.f32 0.0078125, %v2697_v18 }
 0xc57   : > { %v2705_v43 = vadd.f32 1e-05, %v2701_v20 }
 0xc59   : > { %3722 = vrsqrt.f32 %v2705_v43 }
 0xc5a   : > { %v3717_v27 = vpop.eup %3716 }
 0xc5b   : > { %v2710_v26 = vmul.f32 %v3717_v27, %v2682_v54 }
 0xc5d   : > { %v2718_v16 = vmul.f32 %v2717_v11, %v2710_v26 }
 0xc5e   : > { %v3719_v19 = vpop.eup %3718 }
 0xc5f   : > { %v2726_v28 = vadd.f32 %v2725_v15, %v2718_v16  ;;  %v2711_v32 = vmul.f32 %v3719_v19, %v2683_v46 }
 0xc61   : > { %2730 = vst [vmem:[#allocation2 + $0x10] sm:$0xff] %v2726_v28  ;;  %v2719_v30 = vmul.f32 %v2717_v11, %v2711_v32 }
 0xc62   : > { %v3721_v34 = vpop.eup %3720 }
 0xc63   : > { %v2727_v35 = vadd.f32 %v2725_v15, %v2719_v30  ;;  %v2712_v57 = vmul.f32 %v3721_v34, %v2684_v61 }
 0xc65   : > { %2731 = vst [vmem:[#allocation2] sm:$0xff] %v2727_v35  ;;  %v2720_v21 = vmul.f32 %v2717_v11, %v2712_v57 }
 0xc66   : > { %v3723_v41 = vpop.eup %3722 }
 0xc67   : > { %v2728_v37 = vadd.f32 %v2725_v15, %v2720_v21  ;;  %v2713_v42 = vmul.f32 %v3723_v41, %v2685_v5 }
 0xc69   : > { %2732 = vst [vmem:[#allocation2 + $0x18] sm:$0xff] %v2728_v37  ;;  %v2721_v29 = vmul.f32 %v2717_v11, %v2713_v42  ;;  %2737 = sbr.rel (%p3127_p12) target bundleno = 3497 (0xda9), region = 104 }
 0xc6b   : > { %v2729_v59 = vadd.f32 %v2725_v15, %v2721_v29 }
 0xc6d   : > { %2733 = vst [vmem:[#allocation2 + $0x8] sm:$0xff] %v2729_v59 }
 0xc6e   : > { %2739 = vadd.xlane.f32.xlu0 %v2726_v28  ;;  %2743 = vadd.xlane.f32.xlu1 %v2728_v37  ;;  %v2738_v55 = vld [vmem:[%s4870_s21] sm:$0x3] }
 0xc6f   : > { %v2786_v5 = vrot.slane %v2738_v55, %v4359_v38  ;;  %v2794_v9 = vrot.slane %v2738_v55, %v4362_v39 }
 0xc72   : > { %2741 = vadd.xlane.f32.xlu0 %v2727_v35  ;;  %2745 = vadd.xlane.f32.xlu1 %v2729_v59 }
 0xcf7   : > { %v2740_v22 = vpop.xlane.xlu0 %2739  ;;  %v2744_v45 = vpop.xlane.xlu1 %2743 }
 0xcf8   : > { %v2747_v40 = vmul.f32 0.0078125, %v2740_v22  ;;  %v2749_v44 = vmul.f32 0.0078125, %v2744_v45 }
 0xcfa   : > { %v2751_v50 = vsub.f32 %v2726_v28, %v2747_v40  ;;  %v2753_v47 = vsub.f32 %v2728_v37, %v2749_v44 }
 0xcfb   : > { %v2742_v31 = vpop.xlane.xlu0 %2741  ;;  %v2746_v60 = vpop.xlane.xlu1 %2745 }
 0xcfc   : > { %v2748_v1 = vmul.f32 0.0078125, %v2742_v31  ;;  %v2755_v48 = vmul.f32 %v2751_v50, %v2751_v50  ;;  %v2750_v49 = vmul.f32 0.0078125, %v2746_v60  ;;  %v2757_v25 = vmul.f32 %v2753_v47, %v2753_v47 }
 0xcfe   : > { %v2752_v8 = vsub.f32 %v2727_v35, %v2748_v1  ;;  %2759 = vadd.xlane.f32.xlu0 %v2755_v48  ;;  %v2754_v2 = vsub.f32 %v2729_v59, %v2750_v49 }
 0xd00   : > { %v2756_v52 = vmul.f32 %v2752_v8, %v2752_v8  ;;  %v2758_v33 = vmul.f32 %v2754_v2, %v2754_v2 }
 0xd02   : > { %2763 = vadd.xlane.f32.xlu0 %v2757_v25  ;;  %2761 = vadd.xlane.f32.xlu1 %v2756_v52 }
 0xd06   : > { %2765 = vadd.xlane.f32.xlu1 %v2758_v33 }
 0xd87   : > { %v2760_v53 = vpop.xlane.xlu0 %2759 }
 0xd88   : > { %v2767_v54 = vmul.f32 0.0078125, %v2760_v53 }
 0xd8a   : > { %v2771_v51 = vadd.f32 1e-05, %v2767_v54 }
 0xd8b   : > { %v2762_v6 = vpop.xlane.xlu1 %2761  ;;  %v2764_v56 = vpop.xlane.xlu0 %2763 }
 0xd8c   : > { %3728 = vrsqrt.f32 %v2771_v51  ;;  %v2768_v46 = vmul.f32 0.0078125, %v2762_v6  ;;  %v2769_v24 = vmul.f32 0.0078125, %v2764_v56 }
 0xd8e   : > { %v2772_v58 = vadd.f32 1e-05, %v2768_v46  ;;  %v2773_v36 = vadd.f32 1e-05, %v2769_v24 }
 0xd8f   : > { %v2766_v61 = vpop.xlane.xlu1 %2765 }
 0xd90   : > { %3730 = vrsqrt.f32 %v2772_v58  ;;  %v2770_v63 = vmul.f32 0.0078125, %v2766_v61 }
 0xd91   : > { %3732 = vrsqrt.f32 %v2773_v36 }
 0xd92   : > { %v2774_v7 = vadd.f32 1e-05, %v2770_v63 }
 0xd94   : > { %3734 = vrsqrt.f32 %v2774_v7 }
 0xd99   : > { %v3729_v0 = vpop.eup %3728 }
 0xd9a   : > { %v2779_v62 = vmul.f32 %v3729_v0, %v2751_v50 }
 0xd9c   : > { %v2787_v10 = vmul.f32 %v2786_v5, %v2779_v62 }
 0xd9d   : > { %v3731_v4 = vpop.eup %3730 }
 0xd9e   : > { %v3733_v12 = vpop.eup %3732  ;;  %v2795_v3 = vadd.f32 %v2794_v9, %v2787_v10  ;;  %v2780_v13 = vmul.f32 %v3731_v4, %v2752_v8 }
 0xd9f   : > { %v2781_v14 = vmul.f32 %v3733_v12, %v2753_v47 }
 0xda0   : > { %2799 = vst [vmem:[#allocation13] sm:$0xff] %v2795_v3  ;;  %v2788_v17 = vmul.f32 %v2786_v5, %v2780_v13 }
 0xda1   : > { %v3735_v18 = vpop.eup %3734  ;;  %v2789_v20 = vmul.f32 %v2786_v5, %v2781_v14 }
 0xda2   : > { %v2796_v23 = vadd.f32 %v2794_v9, %v2788_v17  ;;  %v2782_v43 = vmul.f32 %v3735_v18, %v2754_v2 }
 0xda3   : > { %v2797_v11 = vadd.f32 %v2794_v9, %v2789_v20 }
 0xda4   : > { %2800 = vst [vmem:[#allocation13 + $0x8] sm:$0xff] %v2796_v23  ;;  %v2790_v27 = vmul.f32 %v2786_v5, %v2782_v43 }
 0xda5   : > { %2801 = vst [vmem:[#allocation13 + $0x10] sm:$0xff] %v2797_v11 }
 0xda6   : > { %v2798_v38 = vadd.f32 %v2794_v9, %v2790_v27 }
 0xda8   : > { %2802 = vst [vmem:[#allocation13 + $0x18] sm:$0xff] %v2798_v38 }
 0xda9 PF: > { %p3407_p13 = scmp.eq.s32.totalorder %s4132_s27, 1  ;;  %s4035_s13 = smov [#allocation13]  }
 0xdaa   : > { %s2813_s15 = sshll.u32 %s4035_s13, 4  ;;  %s2814_s15 = int_to_ptr.vmem [resolvable:$true] %s2813_s15 }
 0xdab   : > { %s3928_s10 = scalar_lea.vmem %s2814_s15, 512  ;;  %p3935_p4 = scmp.lt.s32.totalorder %s2814_s15, %s2814_s15 }
 0xdac   : > { %p3929_p5 = scmp.ne.s32.totalorder %s2814_s15, %s3928_s10  ;;  %p3936_p3 = scmp.lt.s32.totalorder %s3928_s10, %s3928_s10 }
 0xdae   : > { %p3930_p7 = pnand %p3929_p5, %p3407_p13  ;;  %p3937_p0 = por %p3936_p3, %p3935_p4 }
 0xdb0   : > { %p3931_p9 = pneg %p3930_p7 }
 0xdb2   : > { %p3938_p11 = pnand %p3937_p0, %p3931_p9 }
 0xdb4   : > { %3941 = shalt.err (!%p3938_p11)
}
 0xdb5   : > { %s4036_s26 = smov 128   ;;  %s4037_s0 = smov 8  }
 0xdb6   : > { %s4871_s9 = sld [smem:[#allocation31_spill]] }
 0xdbc   : > { %3376 = dma.vmem_to_hbm [thread:$0]  (%p3407_p13), %s2814_s15, 512, %s4871_s9, [#allocation5], %s4036_s26, %s4036_s26, %s4037_s0  }
 0xdbd   : > { %3989 = dma.done.wait (%p3407_p13), [#allocation5], 512  }
 0xdbe   : > { %3991 = vsyncadd (%p3407_p13), [#allocation5], 4294966784 }
 0xdbf PF: > { %s4872_s17 = sld [smem:[#allocation20_spill]]  ;;  %s4876_s21 = smov %s3998_s22 }
 0xdc0   : > { %s4873_s24 = sld [smem:[#allocation18_spill]] }
 0xdc1   : > { %s4874_s23 = sld [smem:[#allocation22_spill]] }
 0xdc2   : > { %s4875_s16 = sld [smem:[#allocation21_spill]] }
 0xdc5   : > { %s25_s26 = sadd.s32 1, %s4872_s17  }
 0xdc6   : > { %p22_p10 = scmp.ge.s32.totalorder %s25_s26, 4   ;;  %s4877_s22 = smov %s4873_s24 }
 0xdc7   : > { %s4878_s24 = smov %s4010_s25 }
 0xdc8   : > { %s4879_s25 = smov %s4875_s16  ;;  %24 = sbr.rel (!%p22_p10) target bundleno = 15 (0xf), region = 178 }
 0xdcd   :  { %2829 = vsyncpa [#allocation4], 1 }
 0xdce   :  { %2831 = vsyncpa [#allocation4 + $0x1], 1 }
 0xdcf   :  { %2832 = vsyncpa [#allocation7], 1 }
 0xdd0   :  { %2833 = vsyncpa [#allocation5], 1 }
 0xdd1   :  { %2835 = vsyncpa [#allocation5 + $0x1], 1 }

</bundles_post_ra>
